<compile_context>
chip_gen: v5e
topology: v5e:2x2
jax: 0.10.0
libtpu: 0.0.40
codegen_flags: <defaults>
</compile_context>

<pallas_src>
import jax
import jax.numpy as jnp
from jax.experimental import pallas as pl
from jax.experimental.pallas import tpu as pltpu


def _round_up(n, m):
    return ((n + m - 1) // m) * m


def _mlp_kernel(x_ref, w1_ref, b1_ref, w2_ref, b2_ref, w3_ref, b3_ref, o_ref):
    # fc1 + ReLU  (bf16 MXU inputs, f32 accumulation)
    h1 = jnp.dot(x_ref[...], w1_ref[...], preferred_element_type=jnp.float32)
    h1 = jnp.maximum(h1 + b1_ref[...], 0.0)
    # fc2 + ReLU
    h1 = h1.astype(w2_ref.dtype)
    h2 = jnp.dot(h1, w2_ref[...], preferred_element_type=jnp.float32)
    h2 = jnp.maximum(h2 + b2_ref[...], 0.0)
    # fc3 (output width 1): VPU multiply + cross-lane reduction instead of a
    # width-1 MXU matmul; bias comes from SMEM.
    logits = jnp.sum(h2 * w3_ref[...], axis=-1, keepdims=True) + b3_ref[0, 0]
    # sigmoid lowers to EUP transcendentals.
    o_ref[...] = jax.nn.sigmoid(logits).astype(o_ref.dtype)


def bool_model_forward(x, w1, b1, w2, b2, w3, b3, *, tile_b=256):
    """Fused BoolModel forward.

    x:  (B, input_size) float32
    w1: (input_size, HP) f32   b1: (1, HP) f32
    w2: (HP, HP) f32           b2: (1, HP) f32
    w3: (1, HP) f32            b3: (1, 1) f32
    where HP = hidden_size zero-padded up to a multiple of 128 lanes.
    """
    B, d_in = x.shape
    hp = w1.shape[1]

    # bf16 MXU operands (accumulation stays f32 inside the kernel).
    xb = x.astype(jnp.bfloat16)
    w1b = w1.astype(jnp.bfloat16)
    w2b = w2.astype(jnp.bfloat16)
    b3s = b3.reshape(1, 1).astype(jnp.float32)

    # Batch tiling (pad rows to a multiple of the tile; zero rows are harmless).
    tb = min(tile_b, _round_up(B, 8))
    b_pad = _round_up(B, tb)
    if b_pad != B:
        xb = jnp.pad(xb, ((0, b_pad - B), (0, 0)))
    grid = (b_pad // tb,)

    flops = 2 * B * (d_in * hp + hp * hp + hp)
    bytes_accessed = (
        xb.size * 2 + w1b.size * 2 + w2b.size * 2
        + (b1.size + b2.size + w3.size + b3s.size + b_pad) * 4
    )

    out = pl.pallas_call(
        _mlp_kernel,
        out_shape=jax.ShapeDtypeStruct((b_pad, 1), jnp.float32),
        grid=grid,
        in_specs=[
            pl.BlockSpec((tb, d_in), lambda i: (i, 0)),          # x tile
            pl.BlockSpec((d_in, hp), lambda i: (0, 0)),          # W1 (resident)
            pl.BlockSpec((1, hp), lambda i: (0, 0)),             # b1 (resident)
            pl.BlockSpec((hp, hp), lambda i: (0, 0)),            # W2 (resident)
            pl.BlockSpec((1, hp), lambda i: (0, 0)),             # b2 (resident)
            pl.BlockSpec((1, hp), lambda i: (0, 0)),             # w3 row
            pl.BlockSpec(memory_space=pltpu.MemorySpace.SMEM),   # b3 scalar
        ],
        out_specs=pl.BlockSpec((tb, 1), lambda i: (i, 0)),
        compiler_params=pltpu.CompilerParams(
            dimension_semantics=("parallel",)),
        cost_estimate=pl.CostEstimate(
            flops=flops, transcendentals=B, bytes_accessed=bytes_accessed),
    )(xb, w1b, b1, w2b, b2, w3, b3s)
    return out[:B]


def init_params(key, input_size, hidden_size, lane_pad=128):
    """nn.Linear-style uniform(-1/sqrt(fan_in), +) init, hidden dim zero-padded
    to a multiple of `lane_pad` lanes. Padding is inert for the forward math."""
    hp = _round_up(hidden_size, lane_pad)
    ks = jax.random.split(key, 6)

    def lin(kw, kb, fan_in, fan_out):
        bound = 1.0 / jnp.sqrt(jnp.float32(fan_in))
        w = jax.random.uniform(kw, (fan_in, fan_out), jnp.float32, -bound, bound)
        b = jax.random.uniform(kb, (1, fan_out), jnp.float32, -bound, bound)
        w = jnp.pad(w, ((0, 0), (0, hp - fan_out)))
        b = jnp.pad(b, ((0, 0), (0, hp - fan_out)))
        return w, b

    w1, b1 = lin(ks[0], ks[1], input_size, hidden_size)
    w2, b2 = lin(ks[2], ks[3], hidden_size, hidden_size)
    w2 = jnp.pad(w2, ((0, hp - hidden_size), (0, 0)))  # pad contracting rows too

    bound3 = 1.0 / jnp.sqrt(jnp.float32(hidden_size))
    w3 = jax.random.uniform(ks[4], (1, hidden_size), jnp.float32, -bound3, bound3)
    w3 = jnp.pad(w3, ((0, 0), (0, hp - hidden_size)))
    b3 = jax.random.uniform(ks[5], (1, 1), jnp.float32, -bound3, bound3)
    return w1, b1, w2, b2, w3, b3


if __name__ == "__main__":
    key = jax.random.PRNGKey(0)
    k_x, k_p = jax.random.split(key)

    batch = 512          # large enough to amortize launch overhead / show tiling
    input_size = 32
    hidden_size = 32

    x = jax.random.normal(k_x, (batch, input_size), jnp.float32)
    params = init_params(k_p, input_size, hidden_size)

    out = bool_model_forward(x, *params, tile_b=256)
    out = jax.block_until_ready(out)

    # Pure-JAX reference with the same bf16-input / f32-accumulate math.
    w1, b1, w2, b2, w3, b3 = params
    xb = x.astype(jnp.bfloat16).astype(jnp.float32)
    w1f = w1.astype(jnp.bfloat16).astype(jnp.float32)
    w2f = w2.astype(jnp.bfloat16).astype(jnp.float32)
    h1 = jnp.maximum(xb @ w1f + b1, 0.0)
    h1 = h1.astype(jnp.bfloat16).astype(jnp.float32)
    h2 = jnp.maximum(h1 @ w2f + b2, 0.0)
    ref = jax.nn.sigmoid(jnp.sum(h2 * w3, axis=-1, keepdims=True) + b3[0, 0])

    assert out.shape == (batch, 1)
    assert jnp.allclose(out, ref, atol=2e-3, rtol=2e-3), float(
        jnp.max(jnp.abs(out - ref)))

    print("KERNEL_OK")
</pallas_src>

<mosaic_0001>
module attributes {stable_mosaic.version = 11 : i64} {
  func.func @_mlp_kernel(%arg0: i32, %arg1: memref<256x32xbf16, #tpu.memory_space<vmem>>, %arg2: memref<32x128xbf16, #tpu.memory_space<vmem>>, %arg3: memref<1x128xf32, #tpu.memory_space<vmem>>, %arg4: memref<128x128xbf16, #tpu.memory_space<vmem>>, %arg5: memref<1x128xf32, #tpu.memory_space<vmem>>, %arg6: memref<1x128xf32, #tpu.memory_space<vmem>>, %arg7: memref<1x1xf32, #tpu.memory_space<smem>>, %arg8: memref<256x1xf32, #tpu.memory_space<vmem>>) attributes {dimension_semantics = [#tpu.dimension_semantics<parallel>], iteration_bounds = array<i64: 2>, scalar_prefetch = 0 : i64, scratch_operands = 0 : i64, tpu.core_type = #tpu.core_type<tc>, window_params = [{transform_indices = @transform_0, window_bounds = array<i64: 256, 32>}, {pipeline_mode = #tpu.pipeline_mode<synchronous>, transform_indices = @transform_1, window_bounds = array<i64: 32, 128>}, {pipeline_mode = #tpu.pipeline_mode<synchronous>, transform_indices = @transform_2, window_bounds = array<i64: 1, 128>}, {pipeline_mode = #tpu.pipeline_mode<synchronous>, transform_indices = @transform_3, window_bounds = array<i64: 128, 128>}, {pipeline_mode = #tpu.pipeline_mode<synchronous>, transform_indices = @transform_4, window_bounds = array<i64: 1, 128>}, {pipeline_mode = #tpu.pipeline_mode<synchronous>, transform_indices = @transform_5, window_bounds = array<i64: 1, 128>}, {transform_indices = @transform_6, window_bounds = array<i64: 1, 1>}, {transform_indices = @transform_7, window_bounds = array<i64: 256, 1>}]} {
    %c0 = arith.constant 0 : index
    %c0_0 = arith.constant 0 : index
    %0 = vector.load %arg1[%c0, %c0_0] : memref<256x32xbf16, #tpu.memory_space<vmem>>, vector<256x32xbf16>
    %c0_1 = arith.constant 0 : index
    %c0_2 = arith.constant 0 : index
    %1 = vector.load %arg2[%c0_1, %c0_2] : memref<32x128xbf16, #tpu.memory_space<vmem>>, vector<32x128xbf16>
    %cst = arith.constant dense<0.000000e+00> : vector<256x128xf32>
    %2 = tpu.matmul %0, %1, %cst {dimension_numbers = #tpu.dot_dimension_numbers<[1], [0], [0], [1], [0, 0, 1, 1], [], []>} : vector<256x32xbf16>, vector<32x128xbf16>, vector<256x128xf32> -> vector<256x128xf32>
    %c0_3 = arith.constant 0 : index
    %c0_4 = arith.constant 0 : index
    %3 = vector.load %arg3[%c0_3, %c0_4] : memref<1x128xf32, #tpu.memory_space<vmem>>, vector<1x128xf32>
    %4 = vector.broadcast %3 : vector<1x128xf32> to vector<256x128xf32>
    %5 = arith.addf %2, %4 : vector<256x128xf32>
    %cst_5 = arith.constant 0.000000e+00 : f32
    %6 = vector.broadcast %cst_5 : f32 to vector<256x128xf32>
    %7 = arith.maximumf %5, %6 : vector<256x128xf32>
    %8 = arith.truncf %7 : vector<256x128xf32> to vector<256x128xbf16>
    %c0_6 = arith.constant 0 : index
    %c0_7 = arith.constant 0 : index
    %9 = vector.load %arg4[%c0_6, %c0_7] : memref<128x128xbf16, #tpu.memory_space<vmem>>, vector<128x128xbf16>
    %cst_8 = arith.constant dense<0.000000e+00> : vector<256x128xf32>
    %10 = tpu.matmul %8, %9, %cst_8 {dimension_numbers = #tpu.dot_dimension_numbers<[1], [0], [0], [1], [0, 0, 1, 1], [], []>} : vector<256x128xbf16>, vector<128x128xbf16>, vector<256x128xf32> -> vector<256x128xf32>
    %c0_9 = arith.constant 0 : index
    %c0_10 = arith.constant 0 : index
    %11 = vector.load %arg5[%c0_9, %c0_10] : memref<1x128xf32, #tpu.memory_space<vmem>>, vector<1x128xf32>
    %12 = vector.broadcast %11 : vector<1x128xf32> to vector<256x128xf32>
    %13 = arith.addf %10, %12 : vector<256x128xf32>
    %cst_11 = arith.constant 0.000000e+00 : f32
    %14 = vector.broadcast %cst_11 : f32 to vector<256x128xf32>
    %15 = arith.maximumf %13, %14 : vector<256x128xf32>
    %c0_12 = arith.constant 0 : index
    %c0_13 = arith.constant 0 : index
    %16 = vector.load %arg6[%c0_12, %c0_13] : memref<1x128xf32, #tpu.memory_space<vmem>>, vector<1x128xf32>
    %17 = vector.broadcast %16 : vector<1x128xf32> to vector<256x128xf32>
    %18 = arith.mulf %15, %17 : vector<256x128xf32>
    %cst_14 = arith.constant dense<0.000000e+00> : vector<256xf32>
    %19 = vector.multi_reduction <add>, %18, %cst_14 [1] : vector<256x128xf32> to vector<256xf32>
    %20 = vector.shape_cast %19 : vector<256xf32> to vector<256x1xf32>
    %c0_15 = arith.constant 0 : index
    %c0_16 = arith.constant 0 : index
    %21 = memref.load %arg7[%c0_15, %c0_16] : memref<1x1xf32, #tpu.memory_space<smem>>
    %22 = vector.broadcast %21 : f32 to vector<256x1xf32>
    %23 = arith.addf %20, %22 : vector<256x1xf32>
    %24 = arith.negf %23 : vector<256x1xf32>
    %25 = math.exp %24 : vector<256x1xf32>
    %cst_17 = arith.constant 1.000000e+00 : f32
    %26 = vector.broadcast %cst_17 : f32 to vector<256x1xf32>
    %27 = arith.addf %26, %25 : vector<256x1xf32>
    %28 = arith.divf %26, %27 : vector<256x1xf32>
    %c0_18 = arith.constant 0 : index
    %c0_19 = arith.constant 0 : index
    %29 = vector.load %arg8[%c0_18, %c0_19] : memref<256x1xf32, #tpu.memory_space<vmem>>, vector<256x1xf32>
    tpu.vector_store %arg8[%c0_18, %c0_19], %28 {strides = array<i32>} : memref<256x1xf32, #tpu.memory_space<vmem>>, vector<256x1xf32>,
    return
  }
  func.func @transform_0(%arg0: i32) -> (i32, i32) {
    %c0_i32 = arith.constant 0 : i32
    %c0_i32_0 = arith.constant 0 : i32
    return %arg0, %c0_i32 : i32, i32
  }
  func.func @transform_1(%arg0: i32) -> (i32, i32) {
    %c0_i32 = arith.constant 0 : i32
    %c0_i32_0 = arith.constant 0 : i32
    %c0_i32_1 = arith.constant 0 : i32
    return %c0_i32, %c0_i32_0 : i32, i32
  }
  func.func @transform_2(%arg0: i32) -> (i32, i32) {
    %c0_i32 = arith.constant 0 : i32
    %c0_i32_0 = arith.constant 0 : i32
    %c0_i32_1 = arith.constant 0 : i32
    return %c0_i32, %c0_i32_0 : i32, i32
  }
  func.func @transform_3(%arg0: i32) -> (i32, i32) {
    %c0_i32 = arith.constant 0 : i32
    %c0_i32_0 = arith.constant 0 : i32
    %c0_i32_1 = arith.constant 0 : i32
    return %c0_i32, %c0_i32_0 : i32, i32
  }
  func.func @transform_4(%arg0: i32) -> (i32, i32) {
    %c0_i32 = arith.constant 0 : i32
    %c0_i32_0 = arith.constant 0 : i32
    %c0_i32_1 = arith.constant 0 : i32
    return %c0_i32, %c0_i32_0 : i32, i32
  }
  func.func @transform_5(%arg0: i32) -> (i32, i32) {
    %c0_i32 = arith.constant 0 : i32
    %c0_i32_0 = arith.constant 0 : i32
    %c0_i32_1 = arith.constant 0 : i32
    return %c0_i32, %c0_i32_0 : i32, i32
  }
  func.func @transform_6(%arg0: i32) -> (i32, i32) {
    %c0_i32 = arith.constant 0 : i32
    %c0_i32_0 = arith.constant 0 : i32
    %c0_i32_1 = arith.constant 0 : i32
    return %c0_i32, %c0_i32_0 : i32, i32
  }
  func.func @transform_7(%arg0: i32) -> (i32, i32) {
    %c0_i32 = arith.constant 0 : i32
    %c0_i32_0 = arith.constant 0 : i32
    return %arg0, %c0_i32 : i32, i32
  }
}

</mosaic_0001>

<bundles_post_ra>
// kernel: tpu_custom_call.1
= control target key start
LH: loop header
LB: loop body
LE: loop exit
PB: predicated region body
PF: predicated region fallthrough
CT: control target
= control target key end

     0   :  { %s2013_s26 = smov 0   ;;  %s2311_s0 = inlined_call_operand.vmem [shape: bf16[512,32], index: 0, kind: input, shape index: {}]   ;;  %s2312_s1 = inlined_call_operand.vmem [shape: bf16[32,128], index: 1, kind: input, shape index: {}]   ;;  %s2313_s2 = inlined_call_operand.vmem [shape: f32[1,128], index: 2, kind: input, shape index: {}]   ;;  %s2314_s3 = inlined_call_operand.vmem [shape: bf16[128,128], index: 3, kind: input, shape index: {}]   ;;  %s2315_s4 = inlined_call_operand.vmem [shape: f32[1,128], index: 4, kind: input, shape index: {}]   ;;  %s2316_s5 = inlined_call_operand.vmem [shape: f32[1,128], index: 5, kind: input, shape index: {}]   ;;  %s2317_s6 = inlined_call_operand.<no memory space> [shape: f32[1,1], index: 6, kind: input, shape index: {}]   ;;  %s2318_s7 = inlined_call_operand.vmem [shape: f32[512,1], index: 7, kind: output, shape index: {}]  }
   0x1   :  { %12 = sst [smem:[#allocation2]] %s2317_s6 }
   0x2 LB: > { %s1622_s27 = sadd.s32 4294967295, %s1968_s26   ;;  %p1626_p0 = scmp.ge.s32.totalorder %s1968_s26, 1  ;;  %s1968_s26 = sphi %s2013_s26, %s18_s26  }
   0x3   : > { %p239_p1 = scmp.lt.s32.totalorder %s1968_s26, 3 }
   0x5   : > { %p240_p2 = pnand %p1626_p0, %p239_p1 }
   0x6   : > { %s1627_s6 = sshll.u32 (!%p240_p2), %s1622_s27, 5  ;;  %s891_s13 = sld [smem:[#allocation2]] (!%p240_p2) }
   0x7   : > { %243 = sbr.rel (%p240_p2) target bundleno = 693 (0x2b5), region = 48  ;;  %p272_p3 = scmp.lt.s32.totalorder (!%p240_p2), %s1627_s6, 63 }
   0xc   : > { %v1802_v0 = vld [vmem:[%s2312_s1 + $0x8] sm:$0xff]  ;;  %v1801_v1 = vld [vmem:[%s2312_s1] sm:$0xff]  ;;  %s2320_s6 = smov (!%p272_p3, %s1627_s6), 63  ;;  %vm416_vm0 = vcmask 261120   ;;  %v1810_v7 = vld [vmem:[%s2314_s3 + $0x38] sm:$0xff]  ;;  %vm1533_vm3 = vcmask 7168  }
   0xd   : > { %471 = vmatpush.bf16.msra.mxu0 %v1802_v0  ;;  %1811 = vmatpush.bf16.msra.mxu3 %v1802_v0  ;;  %s1628_s9 = sshll.u32 %s2320_s6, 2  ;;  %v1809_v9 = vld [vmem:[%s2314_s3 + $0x30] sm:$0xff]  ;;  %v1808_v10 = vld [vmem:[%s2314_s3 + $0x28] sm:$0xff]  ;;  %v1807_v11 = vld [vmem:[%s2314_s3 + $0x20] sm:$0xff]  ;;  %s1630_s14 = sshll.u32 %s2320_s6, 3 }
   0xe   : > { %s2033_s12 = scalar_lea.vmem %s2311_s0, %s1628_s9  ;;  %670 = vmatpush.bf16.msra.mxu1 %v1810_v7  ;;  %1813 = vmatpush.bf16.msra.mxu2 %v1810_v7  ;;  %v1806_v12 = vld [vmem:[%s2314_s3 + $0x18] sm:$0xff]  ;;  %v1805_v14 = vld [vmem:[%s2314_s3 + $0x10] sm:$0xff]  ;;  %v1804_v16 = vld [vmem:[%s2314_s3 + $0x8] sm:$0xff]  ;;  %s2184_s17 = scalar_lea.vmem %s2318_s7, %s1630_s14 }
   0xf   : > { %v1785_v2 = vld [vmem:[%s2033_s12] sm:$0xff]  ;;  %v1786_v3 = vld [vmem:[%s2033_s12 + $0x8] sm:$0xff]  ;;  %v1787_v4 = vld [vmem:[%s2033_s12 + $0x10] sm:$0xff] }
  0x10   : > { %v1788_v5 = vld [vmem:[%s2033_s12 + $0x18] sm:$0xff]  ;;  %v1789_v6 = vld [vmem:[%s2033_s12 + $0x20] sm:$0xff]  ;;  %v1790_v8 = vld [vmem:[%s2033_s12 + $0x28] sm:$0xff] }
  0x11   : > { %472 = vmatpush.bf16.msra.mxu0 %v1801_v1  ;;  %1812 = vmatpush.bf16.msra.mxu3 %v1801_v1  ;;  %v1791_v13 = vld [vmem:[%s2033_s12 + $0x30] sm:$0xff]  ;;  %v1794_v15 = vld [vmem:[%s2033_s12 + $0x48] sm:$0xff]  ;;  %v1803_v17 = vld [vmem:[%s2314_s3] sm:$0xff] }
  0x12   : > { %671 = vmatpush.bf16.msra.mxu1 %v1809_v9  ;;  %1814 = vmatpush.bf16.msra.mxu2 %v1809_v9  ;;  %v1792_v18 = vld [vmem:[%s2033_s12 + $0x38] sm:$0xff]  ;;  %v1795_v19 = vld [vmem:[%s2033_s12 + $0x50] sm:$0xff]  ;;  %v1793_v20 = vld [vmem:[%s2033_s12 + $0x40] sm:$0xff] }
  0x13   : > { %v2083_v22 = vld [vmem:[%s2313_s2] ss:$0 sm:$0xff]  ;;  %v1796_v23 = vld [vmem:[%s2033_s12 + $0x58] sm:$0xff]  ;;  %v1798_v39 = vld [vmem:[%s2033_s12 + $0x68] sm:$0xff] }
  0x14   : > { %1703 = vmatmul.msk.bf16.vlgmr.msra.gmra.mxu0 %vm416_vm0, %v1785_v2  ;;  %1712 = vmatmul.msk.bf16.vlgmr.msra.gmra.mxu3 %vm416_vm0, %v1794_v15  ;;  %v1797_v31 = vld [vmem:[%s2033_s12 + $0x60] sm:$0xff]  ;;  %v1799_v47 = vld [vmem:[%s2033_s12 + $0x70] sm:$0xff]  ;;  %v1800_v55 = vld [vmem:[%s2033_s12 + $0x78] sm:$0xff] }
  0x16   : > { %672 = vmatpush.bf16.msra.mxu1 %v1808_v10  ;;  %1815 = vmatpush.bf16.msra.mxu2 %v1808_v10 }
  0x1a   : > { %673 = vmatpush.bf16.msra.mxu1 %v1807_v11  ;;  %1816 = vmatpush.bf16.msra.mxu2 %v1807_v11 }
  0x1e   : > { %674 = vmatpush.bf16.msra.mxu1 %v1806_v12  ;;  %1817 = vmatpush.bf16.msra.mxu2 %v1806_v12 }
  0x22   : > { %675 = vmatpush.bf16.msra.mxu1 %v1805_v14  ;;  %1818 = vmatpush.bf16.msra.mxu2 %v1805_v14 }
  0x24   : > { %1704 = vmatmul.msk.bf16.gmra.mxu0 %vm416_vm0, %v1786_v3  ;;  %1713 = vmatmul.msk.bf16.gmra.mxu3 %vm416_vm0, %v1795_v19 }
  0x26   : > { %676 = vmatpush.bf16.msra.mxu1 %v1804_v16  ;;  %1819 = vmatpush.bf16.msra.mxu2 %v1804_v16 }
  0x2a   : > { %677 = vmatpush.bf16.msra.mxu1 %v1803_v17  ;;  %1820 = vmatpush.bf16.msra.mxu2 %v1803_v17 }
  0x34   : > { %1705 = vmatmul.msk.bf16.gmra.mxu0 %vm416_vm0, %v1787_v4  ;;  %1714 = vmatmul.msk.bf16.gmra.mxu3 %vm416_vm0, %v1796_v23 }
  0x44   : > { %1706 = vmatmul.msk.bf16.gmra.mxu0 %vm416_vm0, %v1788_v5  ;;  %1715 = vmatmul.msk.bf16.gmra.mxu3 %vm416_vm0, %v1797_v31 }
  0x54   : > { %1707 = vmatmul.msk.bf16.gmra.mxu0 %vm416_vm0, %v1789_v6  ;;  %1716 = vmatmul.msk.bf16.gmra.mxu3 %vm416_vm0, %v1798_v39 }
  0x64   : > { %1708 = vmatmul.msk.bf16.gmra.mxu0 %vm416_vm0, %v1790_v8  ;;  %1717 = vmatmul.msk.bf16.gmra.mxu3 %vm416_vm0, %v1799_v47 }
  0x74   : > { %1709 = vmatmul.msk.bf16.gmra.mxu0 %vm416_vm0, %v1791_v13  ;;  %1718 = vmatmul.msk.bf16.gmra.mxu3 %vm416_vm0, %v1800_v55 }
  0x84   : > { %1710 = vmatmul.msk.bf16.gmra.mxu0 %vm416_vm0, %v1792_v18 }
  0x91   : > { %v474_v21 = vpop.f32.mrf.mxu0 }
  0x92   : > { %v475_v24 = vadd.f32 %v2083_v22, %v474_v21 }
  0x94   : > { %1711 = vmatmul.msk.bf16.gmra.mxu0 %vm416_vm0, %v1793_v20  ;;  %v554_v27 = vmax.f32 %v475_v24, 0.0 }
  0x97   : > { %v519_v13 = vpop.f32.mrf.mxu3 }
  0x99   : > { %v476_v25 = vpop.f32.mrf.mxu0 }
  0x9a   : > { %v477_v26 = vadd.f32 %v2083_v22, %v476_v25 }
  0x9c   : > { %v555_v28 = vmax.f32 %v477_v26, 0.0 }
  0x9e   : > { %v586_v29 = vpack.c.bf16 %v555_v28, %v554_v27  ;;  %v2117_v27 = vld [vmem:[%s2315_s4] ss:$0 sm:$0xff] }
  0x9f   : > { %v521_v17 = vpop.f32.mrf.mxu3 }
  0xa0   : > { %678 = vmatmul.bf16.vlgmr.msra.gmra.mxu1 %v586_v29  ;;  %v522_v39 = vadd.f32 %v2083_v22, %v521_v17 }
  0xa1   : > { %v479_v30 = vpop.f32.mrf.mxu0 }
  0xa2   : > { %v480_v32 = vadd.f32 %v2083_v22, %v479_v30 }
  0xa4   : > { %v556_v35 = vmax.f32 %v480_v32, 0.0 }
  0xa7   : > { %v524_v23 = vpop.f32.mrf.mxu3 }
  0xa9   : > { %v481_v33 = vpop.f32.mrf.mxu0 }
  0xaa   : > { %v482_v34 = vadd.f32 %v2083_v22, %v481_v33  ;;  %v2123_v33 = vld [vmem:[%s2316_s5] ss:$0 sm:$0xff] }
  0xac   : > { %v557_v36 = vmax.f32 %v482_v34, 0.0 }
  0xae   : > { %v587_v37 = vpack.c.bf16 %v557_v36, %v556_v35 }
  0xaf   : > { %v526_v34 = vpop.f32.mrf.mxu3 }
  0xb0   : > { %683 = vmatmul.bf16.gmra.mxu1 %v587_v37 }
  0xb1   : > { %v484_v38 = vpop.f32.mrf.mxu0 }
  0xb2   : > { %v485_v40 = vadd.f32 %v2083_v22, %v484_v38  ;;  %v520_v38 = vadd.f32 %v2083_v22, %v519_v13 }
  0xb4   : > { %v558_v43 = vmax.f32 %v485_v40, 0.0 }
  0xb9   : > { %v486_v41 = vpop.f32.mrf.mxu0 }
  0xba   : > { %v487_v42 = vadd.f32 %v2083_v22, %v486_v41 }
  0xbc   : > { %v559_v44 = vmax.f32 %v487_v42, 0.0  ;;  %v529_v42 = vpop.f32.mrf.mxu3 }
  0xbe   : > { %v588_v45 = vpack.c.bf16 %v559_v44, %v558_v43  ;;  %v572_v43 = vmax.f32 %v520_v38, 0.0  ;;  %v573_v44 = vmax.f32 %v522_v39, 0.0 }
  0xc0   : > { %688 = vmatmul.bf16.gmra.mxu1 %v588_v45 }
  0xc1   : > { %v489_v46 = vpop.f32.mrf.mxu0 }
  0xc2   : > { %v490_v48 = vadd.f32 %v2083_v22, %v489_v46 }
  0xc4   : > { %v560_v51 = vmax.f32 %v490_v48, 0.0  ;;  %v595_v48 = vpack.c.bf16 %v573_v44, %v572_v43 }
  0xc9   : > { %v491_v49 = vpop.f32.mrf.mxu0 }
  0xca   : > { %v492_v50 = vadd.f32 %v2083_v22, %v491_v49 }
  0xcc   : > { %v561_v52 = vmax.f32 %v492_v50, 0.0 }
  0xce   : > { %v589_v53 = vpack.c.bf16 %v561_v52, %v560_v51  ;;  %v531_v51 = vpop.f32.mrf.mxu3 }
  0xd0   : > { %693 = vmatmul.bf16.gmra.mxu1 %v589_v53  ;;  %v525_v53 = vadd.f32 %v2083_v22, %v524_v23 }
  0xd1   : > { %v494_v54 = vpop.f32.mrf.mxu0 }
  0xd2   : > { %v495_v56 = vadd.f32 %v2083_v22, %v494_v54  ;;  %v527_v54 = vadd.f32 %v2083_v22, %v526_v34 }
  0xd4   : > { %v562_v59 = vmax.f32 %v495_v56, 0.0 }
  0xd9   : > { %v496_v57 = vpop.f32.mrf.mxu0 }
  0xda   : > { %v497_v58 = vadd.f32 %v2083_v22, %v496_v57  ;;  %v574_v57 = vmax.f32 %v525_v53, 0.0 }
  0xdc   : > { %v563_v60 = vmax.f32 %v497_v58, 0.0  ;;  %v575_v58 = vmax.f32 %v527_v54, 0.0 }
  0xde   : > { %v590_v61 = vpack.c.bf16 %v563_v60, %v562_v59 }
  0xe0   : > { %698 = vmatmul.bf16.gmra.mxu1 %v590_v61  ;;  %v534_v61 = vpop.f32.mrf.mxu3 }
  0xe1   : > { %v499_v62 = vpop.f32.mrf.mxu0 }
  0xe2   : > { %v500_v63 = vadd.f32 %v2083_v22, %v499_v62 }
  0xe4   : > { %v564_v2 = vmax.f32 %v500_v63, 0.0  ;;  %v596_v63 = vpack.c.bf16 %v575_v58, %v574_v57 }
  0xe9   : > { %v501_v0 = vpop.f32.mrf.mxu0 }
  0xea   : > { %v502_v1 = vadd.f32 %v2083_v22, %v501_v0 }
  0xec   : > { %v565_v3 = vmax.f32 %v502_v1, 0.0 }
  0xee   : > { %v591_v4 = vpack.c.bf16 %v565_v3, %v564_v2  ;;  %v530_v3 = vadd.f32 %v2083_v22, %v529_v42 }
  0xf0   : > { %703 = vmatmul.bf16.gmra.mxu1 %v591_v4  ;;  %v532_v4 = vadd.f32 %v2083_v22, %v531_v51 }
  0xf1   : > { %v504_v5 = vpop.f32.mrf.mxu0 }
  0xf2   : > { %v505_v6 = vadd.f32 %v2083_v22, %v504_v5 }
  0xf4   : > { %v566_v9 = vmax.f32 %v505_v6, 0.0  ;;  %v536_v6 = vpop.f32.mrf.mxu3 }
  0xf9   : > { %v506_v7 = vpop.f32.mrf.mxu0 }
  0xfa   : > { %v507_v8 = vadd.f32 %v2083_v22, %v506_v7 }
  0xfc   : > { %v567_v10 = vmax.f32 %v507_v8, 0.0  ;;  %v576_v8 = vmax.f32 %v530_v3, 0.0 }
  0xfe   : > { %v592_v11 = vpack.c.bf16 %v567_v10, %v566_v9  ;;  %v577_v9 = vmax.f32 %v532_v4, 0.0 }
 0x100   : > { %708 = vmatmul.bf16.gmra.mxu1 %v592_v11  ;;  %v597_v13 = vpack.c.bf16 %v577_v9, %v576_v8 }
 0x101   : > { %v509_v12 = vpop.f32.mrf.mxu0 }
 0x102   : > { %v510_v14 = vadd.f32 %v2083_v22, %v509_v12 }
 0x104   : > { %v568_v18 = vmax.f32 %v510_v14, 0.0 }
 0x109   : > { %v511_v15 = vpop.f32.mrf.mxu0 }
 0x10a   : > { %v512_v16 = vadd.f32 %v2083_v22, %v511_v15  ;;  %v539_v15 = vpop.f32.mrf.mxu3 }
 0x10c   : > { %v569_v19 = vmax.f32 %v512_v16, 0.0 }
 0x10e   : > { %v593_v20 = vpack.c.bf16 %v569_v19, %v568_v18  ;;  %v535_v18 = vadd.f32 %v2083_v22, %v534_v61  ;;  %v537_v19 = vadd.f32 %v2083_v22, %v536_v6 }
 0x110   : > { %713 = vmatmul.bf16.gmra.mxu1 %v593_v20  ;;  %v578_v23 = vmax.f32 %v535_v18, 0.0 }
 0x111   : > { %v514_v21 = vpop.f32.mrf.mxu0 }
 0x112   : > { %v515_v24 = vadd.f32 %v2083_v22, %v514_v21 }
 0x114   : > { %v570_v28 = vmax.f32 %v515_v24, 0.0  ;;  %v579_v24 = vmax.f32 %v537_v19, 0.0 }
 0x119   : > { %v516_v25 = vpop.f32.mrf.mxu0 }
 0x11a   : > { %v517_v26 = vadd.f32 %v2083_v22, %v516_v25 }
 0x11c   : > { %v571_v29 = vmax.f32 %v517_v26, 0.0  ;;  %v541_v26 = vpop.f32.mrf.mxu3 }
 0x11d   : > { %v679_v30 = vpop.f32.mrf.mxu1 }
 0x11e   : > { %v680_v31 = vadd.f32 %v2117_v27, %v679_v30  ;;  %v594_v32 = vpack.c.bf16 %v571_v29, %v570_v28  ;;  %v598_v30 = vpack.c.bf16 %v579_v24, %v578_v23 }
 0x120   : > { %v759_v35 = vmax.f32 %v680_v31, 0.0  ;;  %718 = vmatmul.bf16.vlgmr.msra.gmra.mxu2 %v594_v32 }
 0x122   : > { %v795_v36 = vmul.f32 %v2123_v33, %v759_v35 }
 0x124   : > { %827 = vadd.xlane.f32.xlu0 %v795_v36  ;;  %v544_v35 = vpop.f32.mrf.mxu3  ;;  %v540_v36 = vadd.f32 %v2083_v22, %v539_v15 }
 0x125   : > { %v681_v37 = vpop.f32.mrf.mxu1 }
 0x126   : > { %v682_v40 = vadd.f32 %v2117_v27, %v681_v37  ;;  %v542_v37 = vadd.f32 %v2083_v22, %v541_v26 }
 0x128   : > { %v760_v41 = vmax.f32 %v682_v40, 0.0  ;;  %v580_v40 = vmax.f32 %v540_v36, 0.0 }
 0x12a   : > { %v796_v45 = vmul.f32 %v2123_v33, %v760_v41  ;;  %v581_v41 = vmax.f32 %v542_v37, 0.0 }
 0x12c   : > { %829 = vadd.xlane.f32.xlu0 %v796_v45  ;;  %v599_v45 = vpack.c.bf16 %v581_v41, %v580_v40 }
 0x12d   : > { %v684_v46 = vpop.f32.mrf.mxu1 }
 0x12e   : > { %v685_v47 = vadd.f32 %v2117_v27, %v684_v46  ;;  %v546_v46 = vpop.f32.mrf.mxu3 }
 0x12f   : > { %v547_v51 = vadd.f32 %v2083_v22, %v546_v46 }
 0x130   : > { %v761_v49 = vmax.f32 %v685_v47, 0.0  ;;  %723 = vmatmul.bf16.gmra.mxu2 %v595_v48 }
 0x132   : > { %v797_v50 = vmul.f32 %v2123_v33, %v761_v49 }
 0x134   : > { %831 = vadd.xlane.f32.xlu1 %v797_v50  ;;  %v545_v50 = vadd.f32 %v2083_v22, %v544_v35 }
 0x135   : > { %v686_v52 = vpop.f32.mrf.mxu1 }
 0x136   : > { %v687_v55 = vadd.f32 %v2117_v27, %v686_v52  ;;  %v549_v54 = vpop.f32.mrf.mxu3 }
 0x138   : > { %v762_v56 = vmax.f32 %v687_v55, 0.0  ;;  %v582_v55 = vmax.f32 %v545_v50, 0.0 }
 0x13a   : > { %v798_v59 = vmul.f32 %v2123_v33, %v762_v56  ;;  %v583_v56 = vmax.f32 %v547_v51, 0.0 }
 0x13c   : > { %833 = vadd.xlane.f32.xlu1 %v798_v59 }
 0x13d   : > { %v689_v60 = vpop.f32.mrf.mxu1 }
 0x13e   : > { %v690_v62 = vadd.f32 %v2117_v27, %v689_v60  ;;  %v600_v60 = vpack.c.bf16 %v583_v56, %v582_v55 }
 0x140   : > { %v763_v0 = vmax.f32 %v690_v62, 0.0  ;;  %728 = vmatmul.bf16.gmra.mxu2 %v596_v63  ;;  %v551_v63 = vpop.f32.mrf.mxu3 }
 0x142   : > { %v799_v1 = vmul.f32 %v2123_v33, %v763_v0 }
 0x144   : > { %835 = vadd.xlane.f32.xlu2 %v799_v1  ;;  %v550_v1 = vadd.f32 %v2083_v22, %v549_v54 }
 0x145   : > { %v691_v2 = vpop.f32.mrf.mxu1 }
 0x146   : > { %v692_v5 = vadd.f32 %v2117_v27, %v691_v2  ;;  %v552_v2 = vadd.f32 %v2083_v22, %v551_v63  ;;  %v2168_v22 = vstv %s891_s13 }
 0x148   : > { %v764_v7 = vmax.f32 %v692_v5, 0.0  ;;  %v584_v5 = vmax.f32 %v550_v1, 0.0  ;;  %v585_v6 = vmax.f32 %v552_v2, 0.0 }
 0x14a   : > { %v800_v10 = vmul.f32 %v2123_v33, %v764_v7 }
 0x14c   : > { %837 = vadd.xlane.f32.xlu2 %v800_v10  ;;  %v601_v10 = vpack.c.bf16 %v585_v6, %v584_v5 }
 0x14d   : > { %v694_v11 = vpop.f32.mrf.mxu1 }
 0x14e   : > { %v695_v12 = vadd.f32 %v2117_v27, %v694_v11 }
 0x150   : > { %v765_v14 = vmax.f32 %v695_v12, 0.0  ;;  %733 = vmatmul.bf16.gmra.mxu2 %v597_v13 }
 0x152   : > { %v801_v16 = vmul.f32 %v2123_v33, %v765_v14 }
 0x154   : > { %839 = vadd.xlane.f32.xlu0 %v801_v16 }
 0x155   : > { %v696_v17 = vpop.f32.mrf.mxu1 }
 0x156   : > { %v697_v20 = vadd.f32 %v2117_v27, %v696_v17 }
 0x158   : > { %v766_v21 = vmax.f32 %v697_v20, 0.0 }
 0x15a   : > { %v802_v25 = vmul.f32 %v2123_v33, %v766_v21 }
 0x15c   : > { %841 = vadd.xlane.f32.xlu1 %v802_v25 }
 0x15d   : > { %v699_v28 = vpop.f32.mrf.mxu1 }
 0x15e   : > { %v700_v29 = vadd.f32 %v2117_v27, %v699_v28 }
 0x160   : > { %v767_v31 = vmax.f32 %v700_v29, 0.0  ;;  %738 = vmatmul.bf16.gmra.mxu2 %v598_v30 }
 0x162   : > { %v803_v32 = vmul.f32 %v2123_v33, %v767_v31 }
 0x164   : > { %843 = vadd.xlane.f32.xlu2 %v803_v32 }
 0x165   : > { %v701_v34 = vpop.f32.mrf.mxu1 }
 0x166   : > { %v702_v38 = vadd.f32 %v2117_v27, %v701_v34 }
 0x168   : > { %v768_v39 = vmax.f32 %v702_v38, 0.0 }
 0x16a   : > { %v804_v42 = vmul.f32 %v2123_v33, %v768_v39 }
 0x16c   : > { %845 = vadd.xlane.f32.xlu0 %v804_v42 }
 0x16d   : > { %v704_v43 = vpop.f32.mrf.mxu1 }
 0x16e   : > { %v705_v44 = vadd.f32 %v2117_v27, %v704_v43 }
 0x170   : > { %v769_v47 = vmax.f32 %v705_v44, 0.0  ;;  %743 = vmatmul.bf16.gmra.mxu2 %v599_v45 }
 0x172   : > { %v805_v48 = vmul.f32 %v2123_v33, %v769_v47 }
 0x174   : > { %847 = vadd.xlane.f32.xlu1 %v805_v48 }
 0x175   : > { %v706_v49 = vpop.f32.mrf.mxu1 }
 0x176   : > { %v707_v52 = vadd.f32 %v2117_v27, %v706_v49 }
 0x178   : > { %v770_v53 = vmax.f32 %v707_v52, 0.0 }
 0x17a   : > { %v806_v57 = vmul.f32 %v2123_v33, %v770_v53 }
 0x17c   : > { %849 = vadd.xlane.f32.xlu2 %v806_v57 }
 0x17d   : > { %v709_v58 = vpop.f32.mrf.mxu1 }
 0x17e   : > { %v710_v59 = vadd.f32 %v2117_v27, %v709_v58 }
 0x180   : > { %v771_v61 = vmax.f32 %v710_v59, 0.0  ;;  %748 = vmatmul.bf16.gmra.mxu2 %v600_v60 }
 0x182   : > { %v807_v62 = vmul.f32 %v2123_v33, %v771_v61 }
 0x184   : > { %851 = vadd.xlane.f32.xlu0 %v807_v62 }
 0x185   : > { %v711_v0 = vpop.f32.mrf.mxu1 }
 0x186   : > { %v712_v3 = vadd.f32 %v2117_v27, %v711_v0 }
 0x188   : > { %v772_v4 = vmax.f32 %v712_v3, 0.0 }
 0x18a   : > { %v808_v7 = vmul.f32 %v2123_v33, %v772_v4 }
 0x18c   : > { %853 = vadd.xlane.f32.xlu1 %v808_v7 }
 0x18d   : > { %v714_v8 = vpop.f32.mrf.mxu1 }
 0x18e   : > { %v715_v9 = vadd.f32 %v2117_v27, %v714_v8 }
 0x190   : > { %v773_v11 = vmax.f32 %v715_v9, 0.0  ;;  %753 = vmatmul.bf16.gmra.mxu2 %v601_v10 }
 0x192   : > { %v809_v12 = vmul.f32 %v2123_v33, %v773_v11 }
 0x194   : > { %855 = vadd.xlane.f32.xlu2 %v809_v12 }
 0x195   : > { %v716_v13 = vpop.f32.mrf.mxu1 }
 0x196   : > { %v717_v14 = vadd.f32 %v2117_v27, %v716_v13 }
 0x197   : > { %v828_v15 = vpop.xlane.xlu0 %827 }
 0x198   : > { %v774_v16 = vmax.f32 %v717_v14, 0.0  ;;  %v893_v17 = vadd.f32 %v2168_v22, %v828_v15 }
 0x19a   : > { %v1751_v18 = vmul.f32 -1.442695, %v893_v17  ;;  %v810_v19 = vmul.f32 %v2123_v33, %v774_v16 }
 0x19c   : > { %1832 = vpow2.f32 %v1751_v18  ;;  %857 = vadd.xlane.f32.xlu0 %v810_v19 }
 0x19f   : > { %v830_v20 = vpop.xlane.xlu0 %829 }
 0x1a0   : > { %v894_v21 = vadd.f32 %v2168_v22, %v830_v20 }
 0x1a2   : > { %v1833_v23 = vpop.eup %1832  ;;  %v1752_v24 = vmul.f32 -1.442695, %v894_v21 }
 0x1a3   : > { %v1021_v25 = vadd.f32 1.0, %v1833_v23  ;;  %v719_v26 = vpop.f32.mrf.mxu2 }
 0x1a4   : > { %1834 = vpow2.f32 %v1752_v24  ;;  %v720_v28 = vadd.f32 %v2117_v27, %v719_v26 }
 0x1a5   : > { %1836 = vrcp.f32 %v1021_v25  ;;  %v1062_v43 = vand.u32 2147483647, %v1021_v25  ;;  %v1064_v44 = vand.u32 2147483648, %v1021_v25  ;;  %vm1058_vm2 = vweird.f32 %v1021_v25 }
 0x1a6   : > { %v775_v29 = vmax.f32 %v720_v28, 0.0 }
 0x1a7   : > { %v832_v30 = vpop.xlane.xlu1 %831  ;;  %v1065_v53 = vor.u32 1.1754944e-38, %v1064_v44  ;;  %vm1063_vm5 = vcmp.eq.f32.partialorder %v1062_v43, 8.507059e+37 }
 0x1a8   : > { %v895_v31 = vadd.f32 %v2168_v22, %v832_v30  ;;  %v811_v32 = vmul.f32 %v2123_v33, %v775_v29 }
 0x1aa   : > { %v1835_v34 = vpop.eup %1834  ;;  %v1753_v35 = vmul.f32 -1.442695, %v895_v31  ;;  %859 = vadd.xlane.f32.xlu1 %v811_v32 }
 0x1ab   : > { %v1837_v36 = vpop.eup %1836  ;;  %v1022_v37 = vadd.f32 1.0, %v1835_v34  ;;  %v721_v38 = vpop.f32.mrf.mxu2 }
 0x1ac   : > { %v1054_v39 = vmul.f32 %v1837_v36, %v1021_v25  ;;  %1838 = vpow2.f32 %v1753_v35  ;;  %v722_v40 = vadd.f32 %v2117_v27, %v721_v38  ;;  %vm1059_vm1 = vweird.f32 %v1837_v36 }
 0x1ad   : > { %1840 = vrcp.f32 %v1022_v37  ;;  %vm1060_vm4 = vmor %vm1058_vm2, %vm1059_vm1  ;;  %v1077_v61 = vand.u32 2147483647, %v1022_v37  ;;  %v1079_v62 = vand.u32 2147483648, %v1022_v37  ;;  %vm1073_vm7 = vweird.f32 %v1022_v37 }
 0x1ae   : > { %v1055_v41 = vsub.f32 1.0, %v1054_v39  ;;  %v776_v42 = vmax.f32 %v722_v40, 0.0 }
 0x1af   : > { %v834_v45 = vpop.xlane.xlu1 %833  ;;  %v1080_v8 = vor.u32 1.1754944e-38, %v1079_v62  ;;  %vm1078_vm9 = vcmp.eq.f32.partialorder %v1077_v61, 8.507059e+37 }
 0x1b0   : > { %v1056_v46 = vmul.f32 %v1837_v36, %v1055_v41  ;;  %v896_v47 = vadd.f32 %v2168_v22, %v834_v45  ;;  %v812_v48 = vmul.f32 %v2123_v33, %v776_v42 }
 0x1b2   : > { %v1839_v49 = vpop.eup %1838  ;;  %v1057_v50 = vadd.f32 %v1837_v36, %v1056_v46  ;;  %v1754_v51 = vmul.f32 -1.442695, %v896_v47  ;;  %861 = vadd.xlane.f32.xlu2 %v812_v48 }
 0x1b3   : > { %v1841_v52 = vpop.eup %1840  ;;  %v1023_v54 = vadd.f32 1.0, %v1839_v49  ;;  %v724_v55 = vpop.f32.mrf.mxu2 }
 0x1b4   : > { %v1061_v56 = vsel %vm1060_vm4, %v1837_v36, %v1057_v50  ;;  %v1069_v57 = vmul.f32 %v1841_v52, %v1022_v37  ;;  %1842 = vpow2.f32 %v1754_v51  ;;  %v725_v60 = vadd.f32 %v2117_v27, %v724_v55 }
 0x1b5   : > { %v1066_v58 = vsel %vm1063_vm5, %v1065_v53, %v1061_v56  ;;  %1844 = vrcp.f32 %v1023_v54  ;;  %vm1074_vm6 = vweird.f32 %v1841_v52  ;;  %v1092_v16 = vand.u32 2147483647, %v1023_v54 }
 0x1b6   : > { %1534 = vst.msk [vmem:[%s2184_s17] sm:$0xff] %vm1533_vm3, %v1066_v58  ;;  %v1070_v59 = vsub.f32 1.0, %v1069_v57  ;;  %v777_v1 = vmax.f32 %v725_v60, 0.0  ;;  %vm1075_vm8 = vmor %vm1073_vm7, %vm1074_vm6  ;;  %v1094_v17 = vand.u32 2147483648, %v1023_v54  ;;  %vm1088_vm11 = vweird.f32 %v1023_v54 }
 0x1b7   : > { %v836_v63 = vpop.xlane.xlu2 %835  ;;  %vm1093_vm13 = vcmp.eq.f32.partialorder %v1092_v16, 8.507059e+37 }
 0x1b8   : > { %v1071_v0 = vmul.f32 %v1841_v52, %v1070_v59  ;;  %v897_v2 = vadd.f32 %v2168_v22, %v836_v63  ;;  %v813_v6 = vmul.f32 %v2123_v33, %v777_v1  ;;  %v1095_v29 = vor.u32 1.1754944e-38, %v1094_v17 }
 0x1ba   : > { %v1843_v3 = vpop.eup %1842  ;;  %v1072_v4 = vadd.f32 %v1841_v52, %v1071_v0  ;;  %v1755_v5 = vmul.f32 -1.442695, %v897_v2  ;;  %863 = vadd.xlane.f32.xlu0 %v813_v6 }
 0x1bb   : > { %v1845_v7 = vpop.eup %1844  ;;  %v1024_v9 = vadd.f32 1.0, %v1843_v3  ;;  %v726_v10 = vpop.f32.mrf.mxu2 }
 0x1bc   : > { %v1076_v11 = vsel %vm1075_vm8, %v1841_v52, %v1072_v4  ;;  %v1084_v12 = vmul.f32 %v1845_v7, %v1023_v54  ;;  %1846 = vpow2.f32 %v1755_v5  ;;  %v727_v15 = vadd.f32 %v2117_v27, %v726_v10 }
 0x1bd   : > { %v1081_v13 = vsel %vm1078_vm9, %v1080_v8, %v1076_v11  ;;  %1848 = vrcp.f32 %v1024_v9  ;;  %vm1089_vm10 = vweird.f32 %v1845_v7  ;;  %v1107_v38 = vand.u32 2147483647, %v1024_v9 }
 0x1be   : > { %1535 = vst.msk [vmem:[%s2184_s17 + $0x8] sm:$0xff] %vm1533_vm3, %v1081_v13  ;;  %v1085_v14 = vsub.f32 1.0, %v1084_v12  ;;  %v778_v20 = vmax.f32 %v727_v15, 0.0  ;;  %vm1090_vm12 = vmor %vm1088_vm11, %vm1089_vm10  ;;  %v1109_v39 = vand.u32 2147483648, %v1024_v9  ;;  %vm1103_vm15 = vweird.f32 %v1024_v9 }
 0x1bf   : > { %v838_v18 = vpop.xlane.xlu2 %837  ;;  %vm1108_vm1 = vcmp.eq.f32.partialorder %v1107_v38, 8.507059e+37 }
 0x1c0   : > { %v1086_v19 = vmul.f32 %v1845_v7, %v1085_v14  ;;  %v898_v21 = vadd.f32 %v2168_v22, %v838_v18  ;;  %v814_v26 = vmul.f32 %v2123_v33, %v778_v20  ;;  %v1110_v49 = vor.u32 1.1754944e-38, %v1109_v39 }
 0x1c2   : > { %v1847_v23 = vpop.eup %1846  ;;  %v1087_v24 = vadd.f32 %v1845_v7, %v1086_v19  ;;  %v1756_v25 = vmul.f32 -1.442695, %v898_v21  ;;  %865 = vadd.xlane.f32.xlu1 %v814_v26 }
 0x1c3   : > { %v1849_v28 = vpop.eup %1848  ;;  %v1025_v30 = vadd.f32 1.0, %v1847_v23  ;;  %v729_v31 = vpop.f32.mrf.mxu2 }
 0x1c4   : > { %v1091_v32 = vsel %vm1090_vm12, %v1845_v7, %v1087_v24  ;;  %v1099_v34 = vmul.f32 %v1849_v28, %v1024_v9  ;;  %1850 = vpow2.f32 %v1756_v25  ;;  %v730_v37 = vadd.f32 %v2117_v27, %v729_v31 }
 0x1c5   : > { %v1096_v35 = vsel %vm1093_vm13, %v1095_v29, %v1091_v32  ;;  %1852 = vrcp.f32 %v1025_v30  ;;  %vm1104_vm14 = vweird.f32 %v1849_v28  ;;  %v1122_v57 = vand.u32 2147483647, %v1025_v30 }
 0x1c6   : > { %1536 = vst.msk [vmem:[%s2184_s17 + $0x10] sm:$0xff] %vm1533_vm3, %v1096_v35  ;;  %v1100_v36 = vsub.f32 1.0, %v1099_v34  ;;  %v779_v42 = vmax.f32 %v730_v37, 0.0  ;;  %vm1105_vm0 = vmor %vm1103_vm15, %vm1104_vm14  ;;  %v1124_v58 = vand.u32 2147483648, %v1025_v30  ;;  %vm1118_vm4 = vweird.f32 %v1025_v30 }
 0x1c7   : > { %v840_v40 = vpop.xlane.xlu0 %839  ;;  %vm1123_vm6 = vcmp.eq.f32.partialorder %v1122_v57, 8.507059e+37 }
 0x1c8   : > { %v1101_v41 = vmul.f32 %v1849_v28, %v1100_v36  ;;  %v899_v43 = vadd.f32 %v2168_v22, %v840_v40  ;;  %v815_v47 = vmul.f32 %v2123_v33, %v779_v42  ;;  %v1125_v4 = vor.u32 1.1754944e-38, %v1124_v58 }
 0x1ca   : > { %v1851_v44 = vpop.eup %1850  ;;  %v1102_v45 = vadd.f32 %v1849_v28, %v1101_v41  ;;  %v1757_v46 = vmul.f32 -1.442695, %v899_v43  ;;  %867 = vadd.xlane.f32.xlu2 %v815_v47 }
 0x1cb   : > { %v1853_v48 = vpop.eup %1852  ;;  %v1026_v50 = vadd.f32 1.0, %v1851_v44  ;;  %v731_v51 = vpop.f32.mrf.mxu2 }
 0x1cc   : > { %v1106_v52 = vsel %vm1105_vm0, %v1849_v28, %v1102_v45  ;;  %v1114_v53 = vmul.f32 %v1853_v48, %v1025_v30  ;;  %1854 = vpow2.f32 %v1757_v46  ;;  %v732_v56 = vadd.f32 %v2117_v27, %v731_v51 }
 0x1cd   : > { %v1111_v54 = vsel %vm1108_vm1, %v1110_v49, %v1106_v52  ;;  %1856 = vrcp.f32 %v1026_v50  ;;  %vm1119_vm2 = vweird.f32 %v1853_v48  ;;  %v1137_v12 = vand.u32 2147483647, %v1026_v50 }
 0x1ce   : > { %1537 = vst.msk [vmem:[%s2184_s17 + $0x18] sm:$0xff] %vm1533_vm3, %v1111_v54  ;;  %v1115_v55 = vsub.f32 1.0, %v1114_v53  ;;  %v780_v61 = vmax.f32 %v732_v56, 0.0  ;;  %vm1120_vm5 = vmor %vm1118_vm4, %vm1119_vm2  ;;  %v1139_v13 = vand.u32 2147483648, %v1026_v50  ;;  %vm1133_vm8 = vweird.f32 %v1026_v50 }
 0x1cf   : > { %v842_v59 = vpop.xlane.xlu1 %841  ;;  %vm1138_vm10 = vcmp.eq.f32.partialorder %v1137_v12, 8.507059e+37 }
 0x1d0   : > { %v1116_v60 = vmul.f32 %v1853_v48, %v1115_v55  ;;  %v900_v62 = vadd.f32 %v2168_v22, %v842_v59  ;;  %v816_v2 = vmul.f32 %v2123_v33, %v780_v61  ;;  %v1140_v24 = vor.u32 1.1754944e-38, %v1139_v13 }
 0x1d2   : > { %v1855_v63 = vpop.eup %1854  ;;  %v1117_v0 = vadd.f32 %v1853_v48, %v1116_v60  ;;  %v1758_v1 = vmul.f32 -1.442695, %v900_v62  ;;  %869 = vadd.xlane.f32.xlu0 %v816_v2 }
 0x1d3   : > { %v1857_v3 = vpop.eup %1856  ;;  %v1027_v5 = vadd.f32 1.0, %v1855_v63  ;;  %v734_v6 = vpop.f32.mrf.mxu2 }
 0x1d4   : > { %v1121_v7 = vsel %vm1120_vm5, %v1853_v48, %v1117_v0  ;;  %v1129_v8 = vmul.f32 %v1857_v3, %v1026_v50  ;;  %1858 = vpow2.f32 %v1758_v1  ;;  %v735_v11 = vadd.f32 %v2117_v27, %v734_v6 }
 0x1d5   : > { %v1126_v9 = vsel %vm1123_vm6, %v1125_v4, %v1121_v7  ;;  %1860 = vrcp.f32 %v1027_v5  ;;  %vm1134_vm7 = vweird.f32 %v1857_v3  ;;  %v1152_v34 = vand.u32 2147483647, %v1027_v5 }
 0x1d6   : > { %1538 = vst.msk [vmem:[%s2184_s17 + $0x20] sm:$0xff] %vm1533_vm3, %v1126_v9  ;;  %v1130_v10 = vsub.f32 1.0, %v1129_v8  ;;  %v781_v16 = vmax.f32 %v735_v11, 0.0  ;;  %vm1135_vm9 = vmor %vm1133_vm8, %vm1134_vm7  ;;  %v1154_v35 = vand.u32 2147483648, %v1027_v5  ;;  %vm1148_vm12 = vweird.f32 %v1027_v5 }
 0x1d7   : > { %v844_v14 = vpop.xlane.xlu2 %843  ;;  %vm1153_vm14 = vcmp.eq.f32.partialorder %v1152_v34, 8.507059e+37 }
 0x1d8   : > { %v1131_v15 = vmul.f32 %v1857_v3, %v1130_v10  ;;  %v901_v17 = vadd.f32 %v2168_v22, %v844_v14  ;;  %v817_v21 = vmul.f32 %v2123_v33, %v781_v16  ;;  %v1155_v45 = vor.u32 1.1754944e-38, %v1154_v35 }
 0x1da   : > { %v1859_v18 = vpop.eup %1858  ;;  %v1132_v19 = vadd.f32 %v1857_v3, %v1131_v15  ;;  %v1759_v20 = vmul.f32 -1.442695, %v901_v17  ;;  %871 = vadd.xlane.f32.xlu1 %v817_v21 }
 0x1db   : > { %v1861_v23 = vpop.eup %1860  ;;  %v1028_v25 = vadd.f32 1.0, %v1859_v18  ;;  %v736_v26 = vpop.f32.mrf.mxu2 }
 0x1dc   : > { %v1136_v28 = vsel %vm1135_vm9, %v1857_v3, %v1132_v19  ;;  %v1144_v29 = vmul.f32 %v1861_v23, %v1027_v5  ;;  %1862 = vpow2.f32 %v1759_v20  ;;  %v737_v32 = vadd.f32 %v2117_v27, %v736_v26 }
 0x1dd   : > { %v1141_v30 = vsel %vm1138_vm10, %v1140_v24, %v1136_v28  ;;  %1864 = vrcp.f32 %v1028_v25  ;;  %vm1149_vm11 = vweird.f32 %v1861_v23  ;;  %v1167_v53 = vand.u32 2147483647, %v1028_v25 }
 0x1de   : > { %1539 = vst.msk [vmem:[%s2184_s17 + $0x28] sm:$0xff] %vm1533_vm3, %v1141_v30  ;;  %v1145_v31 = vsub.f32 1.0, %v1144_v29  ;;  %v782_v38 = vmax.f32 %v737_v32, 0.0  ;;  %vm1150_vm13 = vmor %vm1148_vm12, %vm1149_vm11  ;;  %v1169_v54 = vand.u32 2147483648, %v1028_v25  ;;  %vm1163_vm0 = vweird.f32 %v1028_v25 }
 0x1df   : > { %v846_v36 = vpop.xlane.xlu0 %845  ;;  %vm1168_vm2 = vcmp.eq.f32.partialorder %v1167_v53, 8.507059e+37 }
 0x1e0   : > { %v1146_v37 = vmul.f32 %v1861_v23, %v1145_v31  ;;  %v902_v39 = vadd.f32 %v2168_v22, %v846_v36  ;;  %v818_v43 = vmul.f32 %v2123_v33, %v782_v38  ;;  %v1170_v0 = vor.u32 1.1754944e-38, %v1169_v54 }
 0x1e2   : > { %v1863_v40 = vpop.eup %1862  ;;  %v1147_v41 = vadd.f32 %v1861_v23, %v1146_v37  ;;  %v1760_v42 = vmul.f32 -1.442695, %v902_v39  ;;  %873 = vadd.xlane.f32.xlu2 %v818_v43 }
 0x1e3   : > { %v1865_v44 = vpop.eup %1864  ;;  %v1029_v46 = vadd.f32 1.0, %v1863_v40  ;;  %v739_v47 = vpop.f32.mrf.mxu2 }
 0x1e4   : > { %v1151_v48 = vsel %vm1150_vm13, %v1861_v23, %v1147_v41  ;;  %v1159_v49 = vmul.f32 %v1865_v44, %v1028_v25  ;;  %1866 = vpow2.f32 %v1760_v42  ;;  %v740_v52 = vadd.f32 %v2117_v27, %v739_v47 }
 0x1e5   : > { %v1156_v50 = vsel %vm1153_vm14, %v1155_v45, %v1151_v48  ;;  %1868 = vrcp.f32 %v1029_v46  ;;  %vm1164_vm15 = vweird.f32 %v1865_v44  ;;  %v1182_v8 = vand.u32 2147483647, %v1029_v46 }
 0x1e6   : > { %1540 = vst.msk [vmem:[%s2184_s17 + $0x30] sm:$0xff] %vm1533_vm3, %v1156_v50  ;;  %v1160_v51 = vsub.f32 1.0, %v1159_v49  ;;  %v783_v57 = vmax.f32 %v740_v52, 0.0  ;;  %vm1165_vm1 = vmor %vm1163_vm0, %vm1164_vm15  ;;  %v1184_v9 = vand.u32 2147483648, %v1029_v46  ;;  %vm1178_vm5 = vweird.f32 %v1029_v46 }
 0x1e7   : > { %v848_v55 = vpop.xlane.xlu1 %847  ;;  %vm1183_vm7 = vcmp.eq.f32.partialorder %v1182_v8, 8.507059e+37 }
 0x1e8   : > { %v1161_v56 = vmul.f32 %v1865_v44, %v1160_v51  ;;  %v903_v58 = vadd.f32 %v2168_v22, %v848_v55  ;;  %v819_v62 = vmul.f32 %v2123_v33, %v783_v57  ;;  %v1185_v19 = vor.u32 1.1754944e-38, %v1184_v9 }
 0x1ea   : > { %v1867_v59 = vpop.eup %1866  ;;  %v1162_v60 = vadd.f32 %v1865_v44, %v1161_v56  ;;  %v1761_v61 = vmul.f32 -1.442695, %v903_v58  ;;  %875 = vadd.xlane.f32.xlu0 %v819_v62 }
 0x1eb   : > { %v1869_v63 = vpop.eup %1868  ;;  %v1030_v1 = vadd.f32 1.0, %v1867_v59  ;;  %v741_v2 = vpop.f32.mrf.mxu2 }
 0x1ec   : > { %v1166_v3 = vsel %vm1165_vm1, %v1865_v44, %v1162_v60  ;;  %v1174_v4 = vmul.f32 %v1869_v63, %v1029_v46  ;;  %1870 = vpow2.f32 %v1761_v61  ;;  %v742_v7 = vadd.f32 %v2117_v27, %v741_v2 }
 0x1ed   : > { %v1171_v5 = vsel %vm1168_vm2, %v1170_v0, %v1166_v3  ;;  %1872 = vrcp.f32 %v1030_v1  ;;  %vm1179_vm4 = vweird.f32 %v1869_v63  ;;  %v1197_v29 = vand.u32 2147483647, %v1030_v1 }
 0x1ee   : > { %1541 = vst.msk [vmem:[%s2184_s17 + $0x38] sm:$0xff] %vm1533_vm3, %v1171_v5  ;;  %v1175_v6 = vsub.f32 1.0, %v1174_v4  ;;  %v784_v12 = vmax.f32 %v742_v7, 0.0  ;;  %vm1180_vm6 = vmor %vm1178_vm5, %vm1179_vm4  ;;  %v1199_v30 = vand.u32 2147483648, %v1030_v1  ;;  %vm1193_vm9 = vweird.f32 %v1030_v1 }
 0x1ef   : > { %v850_v10 = vpop.xlane.xlu2 %849  ;;  %vm1198_vm11 = vcmp.eq.f32.partialorder %v1197_v29, 8.507059e+37 }
 0x1f0   : > { %v1176_v11 = vmul.f32 %v1869_v63, %v1175_v6  ;;  %v904_v13 = vadd.f32 %v2168_v22, %v850_v10  ;;  %v820_v17 = vmul.f32 %v2123_v33, %v784_v12  ;;  %v1200_v41 = vor.u32 1.1754944e-38, %v1199_v30 }
 0x1f2   : > { %v1871_v14 = vpop.eup %1870  ;;  %v1177_v15 = vadd.f32 %v1869_v63, %v1176_v11  ;;  %v1762_v16 = vmul.f32 -1.442695, %v904_v13  ;;  %877 = vadd.xlane.f32.xlu1 %v820_v17 }
 0x1f3   : > { %v1873_v18 = vpop.eup %1872  ;;  %v1031_v20 = vadd.f32 1.0, %v1871_v14  ;;  %v744_v21 = vpop.f32.mrf.mxu2 }
 0x1f4   : > { %v1181_v23 = vsel %vm1180_vm6, %v1869_v63, %v1177_v15  ;;  %v1189_v24 = vmul.f32 %v1873_v18, %v1030_v1  ;;  %1874 = vpow2.f32 %v1762_v16  ;;  %v745_v28 = vadd.f32 %v2117_v27, %v744_v21 }
 0x1f5   : > { %v1186_v25 = vsel %vm1183_vm7, %v1185_v19, %v1181_v23  ;;  %1876 = vrcp.f32 %v1031_v20  ;;  %vm1194_vm8 = vweird.f32 %v1873_v18  ;;  %v1212_v49 = vand.u32 2147483647, %v1031_v20 }
 0x1f6   : > { %1542 = vst.msk [vmem:[%s2184_s17 + $0x40] sm:$0xff] %vm1533_vm3, %v1186_v25  ;;  %v1190_v26 = vsub.f32 1.0, %v1189_v24  ;;  %v785_v34 = vmax.f32 %v745_v28, 0.0  ;;  %vm1195_vm10 = vmor %vm1193_vm9, %vm1194_vm8  ;;  %v1214_v50 = vand.u32 2147483648, %v1031_v20  ;;  %vm1208_vm13 = vweird.f32 %v1031_v20 }
 0x1f7   : > { %v852_v31 = vpop.xlane.xlu0 %851  ;;  %vm1213_vm15 = vcmp.eq.f32.partialorder %v1212_v49, 8.507059e+37 }
 0x1f8   : > { %v1191_v32 = vmul.f32 %v1873_v18, %v1190_v26  ;;  %v905_v35 = vadd.f32 %v2168_v22, %v852_v31  ;;  %v821_v39 = vmul.f32 %v2123_v33, %v785_v34  ;;  %v1215_v60 = vor.u32 1.1754944e-38, %v1214_v50  ;;  %v1961_v50 = vld [vmem:[%s2316_s5] ss:$0 sm:$0xff] }
 0x1fa   : > { %v1875_v36 = vpop.eup %1874  ;;  %v1192_v37 = vadd.f32 %v1873_v18, %v1191_v32  ;;  %v1763_v38 = vmul.f32 -1.442695, %v905_v35  ;;  %879 = vadd.xlane.f32.xlu2 %v821_v39 }
 0x1fb   : > { %v1877_v40 = vpop.eup %1876  ;;  %v1032_v42 = vadd.f32 1.0, %v1875_v36  ;;  %v746_v43 = vpop.f32.mrf.mxu2 }
 0x1fc   : > { %v1196_v44 = vsel %vm1195_vm10, %v1873_v18, %v1192_v37  ;;  %v1204_v45 = vmul.f32 %v1877_v40, %v1031_v20  ;;  %1878 = vpow2.f32 %v1763_v38  ;;  %v747_v48 = vadd.f32 %v2117_v27, %v746_v43  ;;  %v1960_v43 = vld [vmem:[%s2315_s4] ss:$0 sm:$0xff] }
 0x1fd   : > { %v1201_v46 = vsel %vm1198_vm11, %v1200_v41, %v1196_v44  ;;  %1880 = vrcp.f32 %v1032_v42  ;;  %vm1209_vm12 = vweird.f32 %v1877_v40  ;;  %v1227_v4 = vand.u32 2147483647, %v1032_v42 }
 0x1fe   : > { %1543 = vst.msk [vmem:[%s2184_s17 + $0x48] sm:$0xff] %vm1533_vm3, %v1201_v46  ;;  %v1205_v47 = vsub.f32 1.0, %v1204_v45  ;;  %v786_v53 = vmax.f32 %v747_v48, 0.0  ;;  %vm1210_vm14 = vmor %vm1208_vm13, %vm1209_vm12  ;;  %v1229_v5 = vand.u32 2147483648, %v1032_v42  ;;  %vm1223_vm1 = vweird.f32 %v1032_v42 }
 0x1ff   : > { %v854_v51 = vpop.xlane.xlu1 %853  ;;  %vm1228_vm4 = vcmp.eq.f32.partialorder %v1227_v4, 8.507059e+37 }
 0x200   : > { %v1206_v52 = vmul.f32 %v1877_v40, %v1205_v47  ;;  %v906_v54 = vadd.f32 %v2168_v22, %v854_v51  ;;  %v822_v58 = vmul.f32 %v2123_v33, %v786_v53  ;;  %v1230_v15 = vor.u32 1.1754944e-38, %v1229_v5 }
 0x202   : > { %v1879_v55 = vpop.eup %1878  ;;  %v1207_v56 = vadd.f32 %v1877_v40, %v1206_v52  ;;  %v1764_v57 = vmul.f32 -1.442695, %v906_v54  ;;  %881 = vadd.xlane.f32.xlu0 %v822_v58 }
 0x203   : > { %v1881_v59 = vpop.eup %1880  ;;  %v1033_v61 = vadd.f32 1.0, %v1879_v55  ;;  %v749_v62 = vpop.f32.mrf.mxu2 }
 0x204   : > { %v1211_v63 = vsel %vm1210_vm14, %v1877_v40, %v1207_v56  ;;  %v1219_v0 = vmul.f32 %v1881_v59, %v1032_v42  ;;  %1882 = vpow2.f32 %v1764_v57  ;;  %v750_v3 = vadd.f32 %v2117_v27, %v749_v62 }
 0x205   : > { %v1216_v1 = vsel %vm1213_vm15, %v1215_v60, %v1211_v63  ;;  %1884 = vrcp.f32 %v1033_v61  ;;  %vm1224_vm0 = vweird.f32 %v1881_v59  ;;  %v1242_v24 = vand.u32 2147483647, %v1033_v61 }
 0x206   : > { %1544 = vst.msk [vmem:[%s2184_s17 + $0x50] sm:$0xff] %vm1533_vm3, %v1216_v1  ;;  %v1220_v2 = vsub.f32 1.0, %v1219_v0  ;;  %v787_v8 = vmax.f32 %v750_v3, 0.0  ;;  %vm1225_vm2 = vmor %vm1223_vm1, %vm1224_vm0  ;;  %v1244_v25 = vand.u32 2147483648, %v1033_v61  ;;  %vm1238_vm6 = vweird.f32 %v1033_v61 }
 0x207   : > { %v856_v6 = vpop.xlane.xlu2 %855  ;;  %vm1243_vm8 = vcmp.eq.f32.partialorder %v1242_v24, 8.507059e+37 }
 0x208   : > { %v1221_v7 = vmul.f32 %v1881_v59, %v1220_v2  ;;  %v907_v9 = vadd.f32 %v2168_v22, %v856_v6  ;;  %v823_v13 = vmul.f32 %v2123_v33, %v787_v8  ;;  %v1245_v37 = vor.u32 1.1754944e-38, %v1244_v25 }
 0x20a   : > { %v1883_v10 = vpop.eup %1882  ;;  %v1222_v11 = vadd.f32 %v1881_v59, %v1221_v7  ;;  %v1765_v12 = vmul.f32 -1.442695, %v907_v9  ;;  %883 = vadd.xlane.f32.xlu1 %v823_v13 }
 0x20b   : > { %v1885_v14 = vpop.eup %1884  ;;  %v1034_v16 = vadd.f32 1.0, %v1883_v10  ;;  %v751_v17 = vpop.f32.mrf.mxu2 }
 0x20c   : > { %v1226_v18 = vsel %vm1225_vm2, %v1881_v59, %v1222_v11  ;;  %v1234_v19 = vmul.f32 %v1885_v14, %v1033_v61  ;;  %1886 = vpow2.f32 %v1765_v12  ;;  %v752_v23 = vadd.f32 %v2117_v27, %v751_v17 }
 0x20d   : > { %v1231_v20 = vsel %vm1228_vm4, %v1230_v15, %v1226_v18  ;;  %1888 = vrcp.f32 %v1034_v16  ;;  %vm1239_vm5 = vweird.f32 %v1885_v14  ;;  %v1259_v44 = vand.u32 2147483648, %v1034_v16 }
 0x20e   : > { %1545 = vst.msk [vmem:[%s2184_s17 + $0x58] sm:$0xff] %vm1533_vm3, %v1231_v20  ;;  %v1235_v21 = vsub.f32 1.0, %v1234_v19  ;;  %v788_v29 = vmax.f32 %v752_v23, 0.0  ;;  %vm1240_vm7 = vmor %vm1238_vm6, %vm1239_vm5  ;;  %v1257_v46 = vand.u32 2147483647, %v1034_v16  ;;  %vm1253_vm10 = vweird.f32 %v1034_v16 }
 0x20f   : > { %v858_v26 = vpop.xlane.xlu0 %857  ;;  %v1260_v53 = vor.u32 1.1754944e-38, %v1259_v44 }
 0x210   : > { %v1236_v28 = vmul.f32 %v1885_v14, %v1235_v21  ;;  %v908_v30 = vadd.f32 %v2168_v22, %v858_v26  ;;  %v824_v35 = vmul.f32 %v2123_v33, %v788_v29  ;;  %vm1258_vm12 = vcmp.eq.f32.partialorder %v1257_v46, 8.507059e+37 }
 0x212   : > { %v1887_v31 = vpop.eup %1886  ;;  %v1237_v32 = vadd.f32 %v1885_v14, %v1236_v28  ;;  %v1766_v34 = vmul.f32 -1.442695, %v908_v30  ;;  %885 = vadd.xlane.f32.xlu2 %v824_v35 }
 0x213   : > { %v1889_v36 = vpop.eup %1888  ;;  %v1035_v38 = vadd.f32 1.0, %v1887_v31  ;;  %v754_v27 = vpop.f32.mrf.mxu2 }
 0x214   : > { %v1241_v39 = vsel %vm1240_vm7, %v1885_v14, %v1237_v32  ;;  %v1249_v40 = vmul.f32 %v1889_v36, %v1034_v16  ;;  %1890 = vpow2.f32 %v1766_v34  ;;  %v755_v33 = vadd.f32 %v1960_v43, %v754_v27 }
 0x215   : > { %v1246_v41 = vsel %vm1243_vm8, %v1245_v37, %v1241_v39  ;;  %1892 = vrcp.f32 %v1035_v38  ;;  %vm1254_vm9 = vweird.f32 %v1889_v36  ;;  %v1272_v0 = vand.u32 2147483647, %v1035_v38 }
 0x216   : > { %1546 = vst.msk [vmem:[%s2184_s17 + $0x60] sm:$0xff] %vm1533_vm3, %v1246_v41  ;;  %v1250_v42 = vsub.f32 1.0, %v1249_v40  ;;  %v789_v47 = vmax.f32 %v755_v33, 0.0  ;;  %vm1255_vm11 = vmor %vm1253_vm10, %vm1254_vm9  ;;  %v1274_v1 = vand.u32 2147483648, %v1035_v38  ;;  %vm1268_vm14 = vweird.f32 %v1035_v38 }
 0x217   : > { %vm1273_vm0 = vcmp.eq.f32.partialorder %v1272_v0, 8.507059e+37 }
 0x218   : > { %v1251_v45 = vmul.f32 %v1889_v36, %v1250_v42  ;;  %v825_v51 = vmul.f32 %v1961_v50, %v789_v47  ;;  %v1275_v7 = vor.u32 1.1754944e-38, %v1274_v1 }
 0x21a   : > { %v1891_v48 = vpop.eup %1890  ;;  %v1252_v49 = vadd.f32 %v1889_v36, %v1251_v45  ;;  %887 = vadd.xlane.f32.xlu0 %v825_v51 }
 0x21b   : > { %v1893_v52 = vpop.eup %1892  ;;  %v1036_v54 = vadd.f32 1.0, %v1891_v48  ;;  %v756_v55 = vpop.f32.mrf.mxu2 }
 0x21c   : > { %v1256_v56 = vsel %vm1255_vm11, %v1889_v36, %v1252_v49  ;;  %v1264_v57 = vmul.f32 %v1893_v52, %v1035_v38  ;;  %v757_v58 = vadd.f32 %v1960_v43, %v756_v55  ;;  %vm1269_vm13 = vweird.f32 %v1893_v52 }
 0x21d   : > { %v1261_v59 = vsel %vm1258_vm12, %v1260_v53, %v1256_v56  ;;  %1894 = vrcp.f32 %v1036_v54  ;;  %v860_v60 = vpop.xlane.xlu1 %859  ;;  %vm1270_vm15 = vmor %vm1268_vm14, %vm1269_vm13  ;;  %v1289_v14 = vand.u32 2147483648, %v1036_v54  ;;  %v1287_v17 = vand.u32 2147483647, %v1036_v54 }
 0x21e   : > { %1547 = vst.msk [vmem:[%s2184_s17 + $0x68] sm:$0xff] %vm1533_vm3, %v1261_v59  ;;  %v1265_v61 = vsub.f32 1.0, %v1264_v57  ;;  %v790_v62 = vmax.f32 %v757_v58, 0.0  ;;  %v909_v63 = vadd.f32 %v2168_v22, %v860_v60  ;;  %vm1283_vm2 = vweird.f32 %v1036_v54 }
 0x21f   : > { %v1290_v21 = vor.u32 1.1754944e-38, %v1289_v14  ;;  %vm1288_vm5 = vcmp.eq.f32.partialorder %v1287_v17, 8.507059e+37 }
 0x220   : > { %v1266_v2 = vmul.f32 %v1893_v52, %v1265_v61  ;;  %v1767_v3 = vmul.f32 -1.442695, %v909_v63  ;;  %v826_v4 = vmul.f32 %v1961_v50, %v790_v62 }
 0x222   : > { %v1267_v5 = vadd.f32 %v1893_v52, %v1266_v2  ;;  %1896 = vpow2.f32 %v1767_v3  ;;  %889 = vadd.xlane.f32.xlu1 %v826_v4 }
 0x223   : > { %v1895_v6 = vpop.eup %1894 }
 0x224   : > { %v1271_v8 = vsel %vm1270_vm15, %v1893_v52, %v1267_v5  ;;  %v1279_v9 = vmul.f32 %v1895_v6, %v1036_v54  ;;  %vm1284_vm1 = vweird.f32 %v1895_v6 }
 0x225   : > { %v1276_v10 = vsel %vm1273_vm0, %v1275_v7, %v1271_v8  ;;  %v862_v11 = vpop.xlane.xlu2 %861  ;;  %vm1285_vm4 = vmor %vm1283_vm2, %vm1284_vm1 }
 0x226   : > { %1548 = vst.msk [vmem:[%s2184_s17 + $0x70] sm:$0xff] %vm1533_vm3, %v1276_v10  ;;  %v1280_v12 = vsub.f32 1.0, %v1279_v9  ;;  %v910_v13 = vadd.f32 %v2168_v22, %v862_v11 }
 0x228   : > { %v1897_v15 = vpop.eup %1896  ;;  %v1281_v16 = vmul.f32 %v1895_v6, %v1280_v12  ;;  %v1768_v18 = vmul.f32 -1.442695, %v910_v13 }
 0x229   : > { %v1037_v19 = vadd.f32 1.0, %v1897_v15 }
 0x22a   : > { %v1282_v20 = vadd.f32 %v1895_v6, %v1281_v16  ;;  %1898 = vpow2.f32 %v1768_v18 }
 0x22b   : > { %1900 = vrcp.f32 %v1037_v19  ;;  %v1304_v35 = vand.u32 2147483648, %v1037_v19  ;;  %v1302_v37 = vand.u32 2147483647, %v1037_v19  ;;  %vm1298_vm7 = vweird.f32 %v1037_v19 }
 0x22c   : > { %v1286_v23 = vsel %vm1285_vm4, %v1895_v6, %v1282_v20 }
 0x22d   : > { %v1291_v24 = vsel %vm1288_vm5, %v1290_v21, %v1286_v23  ;;  %v864_v25 = vpop.xlane.xlu0 %863  ;;  %v1305_v41 = vor.u32 1.1754944e-38, %v1304_v35  ;;  %vm1303_vm9 = vcmp.eq.f32.partialorder %v1302_v37, 8.507059e+37 }
 0x22e   : > { %1549 = vst.msk [vmem:[%s2184_s17 + $0x78] sm:$0xff] %vm1533_vm3, %v1291_v24  ;;  %v911_v28 = vadd.f32 %v2168_v22, %v864_v25 }
 0x230   : > { %v1899_v26 = vpop.eup %1898  ;;  %v1769_v32 = vmul.f32 -1.442695, %v911_v28 }
 0x231   : > { %v1901_v29 = vpop.eup %1900  ;;  %v1038_v30 = vadd.f32 1.0, %v1899_v26 }
 0x232   : > { %v1294_v31 = vmul.f32 %v1901_v29, %v1037_v19  ;;  %vm1299_vm6 = vweird.f32 %v1901_v29 }
 0x233   : > { %1902 = vrcp.f32 %v1038_v30  ;;  %vm1300_vm8 = vmor %vm1298_vm7, %vm1299_vm6  ;;  %v1319_v48 = vand.u32 2147483648, %v1038_v30  ;;  %v1317_v50 = vand.u32 2147483647, %v1038_v30  ;;  %vm1313_vm11 = vweird.f32 %v1038_v30 }
 0x234   : > { %v1295_v34 = vsub.f32 1.0, %v1294_v31  ;;  %1904 = vpow2.f32 %v1769_v32 }
 0x235   : > { %v866_v38 = vpop.xlane.xlu1 %865  ;;  %v1320_v54 = vor.u32 1.1754944e-38, %v1319_v48  ;;  %vm1318_vm13 = vcmp.eq.f32.partialorder %v1317_v50, 8.507059e+37 }
 0x236   : > { %v1296_v36 = vmul.f32 %v1901_v29, %v1295_v34  ;;  %v912_v39 = vadd.f32 %v2168_v22, %v866_v38 }
 0x238   : > { %v1297_v27 = vadd.f32 %v1901_v29, %v1296_v36  ;;  %v1770_v44 = vmul.f32 -1.442695, %v912_v39 }
 0x239   : > { %v1903_v40 = vpop.eup %1902 }
 0x23a   : > { %v1905_v42 = vpop.eup %1904  ;;  %v1301_v43 = vsel %vm1300_vm8, %v1901_v29, %v1297_v27  ;;  %v1309_v33 = vmul.f32 %v1903_v40, %v1038_v30  ;;  %1906 = vpow2.f32 %v1770_v44  ;;  %vm1314_vm10 = vweird.f32 %v1903_v40 }
 0x23b   : > { %v1306_v45 = vsel %vm1303_vm9, %v1305_v41, %v1301_v43  ;;  %v1039_v46 = vadd.f32 1.0, %v1905_v42  ;;  %vm1315_vm12 = vmor %vm1313_vm11, %vm1314_vm10 }
 0x23c   : > { %1550 = vst.msk [vmem:[%s2184_s17 + $0x80] sm:$0xff] %vm1533_vm3, %v1306_v45  ;;  %v1310_v47 = vsub.f32 1.0, %v1309_v33 }
 0x23d   : > { %1908 = vrcp.f32 %v1039_v46  ;;  %v868_v51 = vpop.xlane.xlu2 %867  ;;  %v1334_v63 = vand.u32 2147483648, %v1039_v46  ;;  %v1332_v2 = vand.u32 2147483647, %v1039_v46  ;;  %vm1328_vm15 = vweird.f32 %v1039_v46 }
 0x23e   : > { %v1311_v49 = vmul.f32 %v1903_v40, %v1310_v47  ;;  %v913_v53 = vadd.f32 %v2168_v22, %v868_v51 }
 0x23f   : > { %v1335_v8 = vor.u32 1.1754944e-38, %v1334_v63  ;;  %vm1333_vm1 = vcmp.eq.f32.partialorder %v1332_v2, 8.507059e+37 }
 0x240   : > { %v1312_v52 = vadd.f32 %v1903_v40, %v1311_v49  ;;  %v1907_v55 = vpop.eup %1906  ;;  %v1771_v57 = vmul.f32 -1.442695, %v913_v53 }
 0x241   : > { %v1040_v60 = vadd.f32 1.0, %v1907_v55 }
 0x242   : > { %v1316_v56 = vsel %vm1315_vm12, %v1903_v40, %v1312_v52  ;;  %1910 = vpow2.f32 %v1771_v57 }
 0x243   : > { %v1909_v58 = vpop.eup %1908  ;;  %v1321_v59 = vsel %vm1318_vm13, %v1320_v54, %v1316_v56  ;;  %1912 = vrcp.f32 %v1040_v60  ;;  %v1349_v14 = vand.u32 2147483648, %v1040_v60  ;;  %v1347_v17 = vand.u32 2147483647, %v1040_v60 }
 0x244   : > { %1551 = vst.msk [vmem:[%s2184_s17 + $0x88] sm:$0xff] %vm1533_vm3, %v1321_v59  ;;  %v1324_v61 = vmul.f32 %v1909_v58, %v1039_v46  ;;  %vm1329_vm14 = vweird.f32 %v1909_v58  ;;  %vm1343_vm4 = vweird.f32 %v1040_v60 }
 0x245   : > { %v870_v0 = vpop.xlane.xlu0 %869  ;;  %vm1330_vm0 = vmor %vm1328_vm15, %vm1329_vm14  ;;  %v1350_v24 = vor.u32 1.1754944e-38, %v1349_v14  ;;  %vm1348_vm6 = vcmp.eq.f32.partialorder %v1347_v17, 8.507059e+37 }
 0x246   : > { %v1325_v62 = vsub.f32 1.0, %v1324_v61  ;;  %v914_v3 = vadd.f32 %v2168_v22, %v870_v0 }
 0x248   : > { %v1326_v1 = vmul.f32 %v1909_v58, %v1325_v62  ;;  %v1911_v4 = vpop.eup %1910  ;;  %v1772_v6 = vmul.f32 -1.442695, %v914_v3 }
 0x249   : > { %v1913_v7 = vpop.eup %1912  ;;  %v1041_v9 = vadd.f32 1.0, %v1911_v4 }
 0x24a   : > { %v1327_v5 = vadd.f32 %v1909_v58, %v1326_v1  ;;  %v1339_v11 = vmul.f32 %v1913_v7, %v1040_v60  ;;  %1914 = vpow2.f32 %v1772_v6  ;;  %vm1344_vm2 = vweird.f32 %v1913_v7 }
 0x24b   : > { %1916 = vrcp.f32 %v1041_v9  ;;  %vm1345_vm5 = vmor %vm1343_vm4, %vm1344_vm2  ;;  %v1364_v31 = vand.u32 2147483648, %v1041_v9  ;;  %v1362_v35 = vand.u32 2147483647, %v1041_v9  ;;  %vm1358_vm8 = vweird.f32 %v1041_v9 }
 0x24c   : > { %v1331_v10 = vsel %vm1330_vm0, %v1909_v58, %v1327_v5  ;;  %v1340_v13 = vsub.f32 1.0, %v1339_v11 }
 0x24d   : > { %v1336_v12 = vsel %vm1333_vm1, %v1335_v8, %v1331_v10  ;;  %v872_v15 = vpop.xlane.xlu1 %871  ;;  %v1365_v40 = vor.u32 1.1754944e-38, %v1364_v31  ;;  %vm1363_vm10 = vcmp.eq.f32.partialorder %v1362_v35, 8.507059e+37 }
 0x24e   : > { %1552 = vst.msk [vmem:[%s2184_s17 + $0x90] sm:$0xff] %vm1533_vm3, %v1336_v12  ;;  %v1341_v16 = vmul.f32 %v1913_v7, %v1340_v13  ;;  %v915_v18 = vadd.f32 %v2168_v22, %v872_v15 }
 0x250   : > { %v1915_v19 = vpop.eup %1914  ;;  %v1342_v20 = vadd.f32 %v1913_v7, %v1341_v16  ;;  %v1773_v21 = vmul.f32 -1.442695, %v915_v18 }
 0x251   : > { %v1917_v23 = vpop.eup %1916  ;;  %v1042_v25 = vadd.f32 1.0, %v1915_v19 }
 0x252   : > { %v1346_v26 = vsel %vm1345_vm5, %v1913_v7, %v1342_v20  ;;  %v1354_v28 = vmul.f32 %v1917_v23, %v1041_v9  ;;  %1918 = vpow2.f32 %v1773_v21  ;;  %vm1359_vm7 = vweird.f32 %v1917_v23 }
 0x253   : > { %v1351_v29 = vsel %vm1348_vm6, %v1350_v24, %v1346_v26  ;;  %1920 = vrcp.f32 %v1042_v25  ;;  %vm1360_vm9 = vmor %vm1358_vm8, %vm1359_vm7  ;;  %v1379_v45 = vand.u32 2147483648, %v1042_v25  ;;  %v1377_v48 = vand.u32 2147483647, %v1042_v25 }
 0x254   : > { %1553 = vst.msk [vmem:[%s2184_s17 + $0x98] sm:$0xff] %vm1533_vm3, %v1351_v29  ;;  %v1355_v30 = vsub.f32 1.0, %v1354_v28  ;;  %vm1373_vm12 = vweird.f32 %v1042_v25 }
 0x255   : > { %v874_v32 = vpop.xlane.xlu2 %873  ;;  %v1380_v54 = vor.u32 1.1754944e-38, %v1379_v45  ;;  %vm1378_vm14 = vcmp.eq.f32.partialorder %v1377_v48, 8.507059e+37 }
 0x256   : > { %v1356_v34 = vmul.f32 %v1917_v23, %v1355_v30  ;;  %v916_v36 = vadd.f32 %v2168_v22, %v874_v32 }
 0x258   : > { %v1919_v37 = vpop.eup %1918  ;;  %v1357_v38 = vadd.f32 %v1917_v23, %v1356_v34  ;;  %v1774_v27 = vmul.f32 -1.442695, %v916_v36 }
 0x259   : > { %v1921_v39 = vpop.eup %1920  ;;  %v1043_v41 = vadd.f32 1.0, %v1919_v37 }
 0x25a   : > { %v1361_v42 = vsel %vm1360_vm9, %v1917_v23, %v1357_v38  ;;  %v1369_v43 = vmul.f32 %v1921_v39, %v1042_v25  ;;  %1922 = vpow2.f32 %v1774_v27  ;;  %vm1374_vm11 = vweird.f32 %v1921_v39 }
 0x25b   : > { %v1366_v33 = vsel %vm1363_vm10, %v1365_v40, %v1361_v42  ;;  %1924 = vrcp.f32 %v1043_v41  ;;  %vm1375_vm13 = vmor %vm1373_vm12, %vm1374_vm11  ;;  %v1394_v60 = vand.u32 2147483648, %v1043_v41  ;;  %v1392_v63 = vand.u32 2147483647, %v1043_v41 }
 0x25c   : > { %1554 = vst.msk [vmem:[%s2184_s17 + $0xa0] sm:$0xff] %vm1533_vm3, %v1366_v33  ;;  %v1370_v44 = vsub.f32 1.0, %v1369_v43  ;;  %vm1388_vm0 = vweird.f32 %v1043_v41 }
 0x25d   : > { %v876_v46 = vpop.xlane.xlu0 %875  ;;  %v1395_v5 = vor.u32 1.1754944e-38, %v1394_v60  ;;  %vm1393_vm2 = vcmp.eq.f32.partialorder %v1392_v63, 8.507059e+37 }
 0x25e   : > { %v1371_v47 = vmul.f32 %v1921_v39, %v1370_v44  ;;  %v917_v49 = vadd.f32 %v2168_v22, %v876_v46 }
 0x260   : > { %v1923_v50 = vpop.eup %1922  ;;  %v1372_v51 = vadd.f32 %v1921_v39, %v1371_v47  ;;  %v1775_v52 = vmul.f32 -1.442695, %v917_v49 }
 0x261   : > { %v1925_v53 = vpop.eup %1924  ;;  %v1044_v55 = vadd.f32 1.0, %v1923_v50 }
 0x262   : > { %v1376_v56 = vsel %vm1375_vm13, %v1921_v39, %v1372_v51  ;;  %v1384_v57 = vmul.f32 %v1925_v53, %v1043_v41  ;;  %1926 = vpow2.f32 %v1775_v52  ;;  %vm1389_vm15 = vweird.f32 %v1925_v53 }
 0x263   : > { %v1381_v58 = vsel %vm1378_vm14, %v1380_v54, %v1376_v56  ;;  %1928 = vrcp.f32 %v1044_v55  ;;  %vm1390_vm1 = vmor %vm1388_vm0, %vm1389_vm15  ;;  %v1409_v11 = vand.u32 2147483648, %v1044_v55  ;;  %v1407_v14 = vand.u32 2147483647, %v1044_v55 }
 0x264   : > { %1555 = vst.msk [vmem:[%s2184_s17 + $0xa8] sm:$0xff] %vm1533_vm3, %v1381_v58  ;;  %v1385_v59 = vsub.f32 1.0, %v1384_v57  ;;  %vm1403_vm5 = vweird.f32 %v1044_v55 }
 0x265   : > { %v878_v61 = vpop.xlane.xlu1 %877  ;;  %v1410_v20 = vor.u32 1.1754944e-38, %v1409_v11  ;;  %vm1408_vm7 = vcmp.eq.f32.partialorder %v1407_v14, 8.507059e+37 }
 0x266   : > { %v1386_v62 = vmul.f32 %v1925_v53, %v1385_v59  ;;  %v918_v0 = vadd.f32 %v2168_v22, %v878_v61 }
 0x268   : > { %v1927_v1 = vpop.eup %1926  ;;  %v1387_v2 = vadd.f32 %v1925_v53, %v1386_v62  ;;  %v1776_v3 = vmul.f32 -1.442695, %v918_v0 }
 0x269   : > { %v1929_v4 = vpop.eup %1928  ;;  %v1045_v6 = vadd.f32 1.0, %v1927_v1 }
 0x26a   : > { %v1391_v7 = vsel %vm1390_vm1, %v1925_v53, %v1387_v2  ;;  %v1399_v8 = vmul.f32 %v1929_v4, %v1044_v55  ;;  %1930 = vpow2.f32 %v1776_v3  ;;  %vm1404_vm4 = vweird.f32 %v1929_v4 }
 0x26b   : > { %v1396_v9 = vsel %vm1393_vm2, %v1395_v5, %v1391_v7  ;;  %1932 = vrcp.f32 %v1045_v6  ;;  %vm1405_vm6 = vmor %vm1403_vm5, %vm1404_vm4  ;;  %v1424_v28 = vand.u32 2147483648, %v1045_v6  ;;  %v1422_v31 = vand.u32 2147483647, %v1045_v6 }
 0x26c   : > { %1556 = vst.msk [vmem:[%s2184_s17 + $0xb0] sm:$0xff] %vm1533_vm3, %v1396_v9  ;;  %v1400_v10 = vsub.f32 1.0, %v1399_v8  ;;  %vm1418_vm9 = vweird.f32 %v1045_v6 }
 0x26d   : > { %v880_v12 = vpop.xlane.xlu2 %879  ;;  %v1425_v38 = vor.u32 1.1754944e-38, %v1424_v28  ;;  %vm1423_vm11 = vcmp.eq.f32.partialorder %v1422_v31, 8.507059e+37 }
 0x26e   : > { %v1401_v13 = vmul.f32 %v1929_v4, %v1400_v10  ;;  %v919_v15 = vadd.f32 %v2168_v22, %v880_v12 }
 0x270   : > { %v1931_v16 = vpop.eup %1930  ;;  %v1402_v17 = vadd.f32 %v1929_v4, %v1401_v13  ;;  %v1777_v18 = vmul.f32 -1.442695, %v919_v15 }
 0x271   : > { %v1933_v19 = vpop.eup %1932  ;;  %v1046_v21 = vadd.f32 1.0, %v1931_v16 }
 0x272   : > { %v1406_v23 = vsel %vm1405_vm6, %v1929_v4, %v1402_v17  ;;  %v1414_v24 = vmul.f32 %v1933_v19, %v1045_v6  ;;  %1934 = vpow2.f32 %v1777_v18  ;;  %vm1419_vm8 = vweird.f32 %v1933_v19 }
 0x273   : > { %v1411_v25 = vsel %vm1408_vm7, %v1410_v20, %v1406_v23  ;;  %1936 = vrcp.f32 %v1046_v21  ;;  %vm1420_vm10 = vmor %vm1418_vm9, %vm1419_vm8  ;;  %v1439_v43 = vand.u32 2147483648, %v1046_v21  ;;  %v1437_v45 = vand.u32 2147483647, %v1046_v21 }
 0x274   : > { %1557 = vst.msk [vmem:[%s2184_s17 + $0xb8] sm:$0xff] %vm1533_vm3, %v1411_v25  ;;  %v1415_v26 = vsub.f32 1.0, %v1414_v24  ;;  %vm1433_vm13 = vweird.f32 %v1046_v21 }
 0x275   : > { %v882_v29 = vpop.xlane.xlu0 %881  ;;  %v1440_v51 = vor.u32 1.1754944e-38, %v1439_v43  ;;  %vm1438_vm15 = vcmp.eq.f32.partialorder %v1437_v45, 8.507059e+37 }
 0x276   : > { %v1416_v30 = vmul.f32 %v1933_v19, %v1415_v26  ;;  %v920_v32 = vadd.f32 %v2168_v22, %v882_v29 }
 0x278   : > { %v1935_v34 = vpop.eup %1934  ;;  %v1417_v35 = vadd.f32 %v1933_v19, %v1416_v30  ;;  %v1778_v36 = vmul.f32 -1.442695, %v920_v32 }
 0x279   : > { %v1937_v37 = vpop.eup %1936  ;;  %v1047_v27 = vadd.f32 1.0, %v1935_v34 }
 0x27a   : > { %v1421_v39 = vsel %vm1420_vm10, %v1933_v19, %v1417_v35  ;;  %v1429_v40 = vmul.f32 %v1937_v37, %v1046_v21  ;;  %1938 = vpow2.f32 %v1778_v36  ;;  %vm1434_vm12 = vweird.f32 %v1937_v37 }
 0x27b   : > { %v1426_v41 = vsel %vm1423_vm11, %v1425_v38, %v1421_v39  ;;  %1940 = vrcp.f32 %v1047_v27  ;;  %vm1435_vm14 = vmor %vm1433_vm13, %vm1434_vm12  ;;  %v1454_v57 = vand.u32 2147483648, %v1047_v27  ;;  %v1452_v60 = vand.u32 2147483647, %v1047_v27 }
 0x27c   : > { %1558 = vst.msk [vmem:[%s2184_s17 + $0xc0] sm:$0xff] %vm1533_vm3, %v1426_v41  ;;  %v1430_v42 = vsub.f32 1.0, %v1429_v40  ;;  %vm1448_vm1 = vweird.f32 %v1047_v27 }
 0x27d   : > { %v884_v33 = vpop.xlane.xlu1 %883  ;;  %v1455_v2 = vor.u32 1.1754944e-38, %v1454_v57  ;;  %vm1453_vm4 = vcmp.eq.f32.partialorder %v1452_v60, 8.507059e+37 }
 0x27e   : > { %v1431_v44 = vmul.f32 %v1937_v37, %v1430_v42  ;;  %v921_v46 = vadd.f32 %v2168_v22, %v884_v33 }
 0x280   : > { %v1939_v47 = vpop.eup %1938  ;;  %v1432_v48 = vadd.f32 %v1937_v37, %v1431_v44  ;;  %v1779_v49 = vmul.f32 -1.442695, %v921_v46 }
 0x281   : > { %v1941_v50 = vpop.eup %1940  ;;  %v1048_v52 = vadd.f32 1.0, %v1939_v47 }
 0x282   : > { %v1436_v53 = vsel %vm1435_vm14, %v1937_v37, %v1432_v48  ;;  %v1444_v54 = vmul.f32 %v1941_v50, %v1047_v27  ;;  %1942 = vpow2.f32 %v1779_v49  ;;  %vm1449_vm0 = vweird.f32 %v1941_v50 }
 0x283   : > { %v1441_v55 = vsel %vm1438_vm15, %v1440_v51, %v1436_v53  ;;  %1944 = vrcp.f32 %v1048_v52  ;;  %vm1450_vm2 = vmor %vm1448_vm1, %vm1449_vm0  ;;  %v1469_v8 = vand.u32 2147483648, %v1048_v52  ;;  %v1467_v11 = vand.u32 2147483647, %v1048_v52 }
 0x284   : > { %1559 = vst.msk [vmem:[%s2184_s17 + $0xc8] sm:$0xff] %vm1533_vm3, %v1441_v55  ;;  %v1445_v56 = vsub.f32 1.0, %v1444_v54  ;;  %vm1463_vm6 = vweird.f32 %v1048_v52 }
 0x285   : > { %v886_v58 = vpop.xlane.xlu2 %885  ;;  %v1470_v17 = vor.u32 1.1754944e-38, %v1469_v8  ;;  %vm1468_vm8 = vcmp.eq.f32.partialorder %v1467_v11, 8.507059e+37 }
 0x286   : > { %v1446_v59 = vmul.f32 %v1941_v50, %v1445_v56  ;;  %v922_v61 = vadd.f32 %v2168_v22, %v886_v58 }
 0x288   : > { %v1943_v62 = vpop.eup %1942  ;;  %v1447_v63 = vadd.f32 %v1941_v50, %v1446_v59  ;;  %v1780_v0 = vmul.f32 -1.442695, %v922_v61 }
 0x289   : > { %v1945_v1 = vpop.eup %1944  ;;  %v1049_v3 = vadd.f32 1.0, %v1943_v62 }
 0x28a   : > { %v1451_v4 = vsel %vm1450_vm2, %v1941_v50, %v1447_v63  ;;  %v1459_v5 = vmul.f32 %v1945_v1, %v1048_v52  ;;  %1946 = vpow2.f32 %v1780_v0  ;;  %vm1464_vm5 = vweird.f32 %v1945_v1 }
 0x28b   : > { %v1456_v6 = vsel %vm1453_vm4, %v1455_v2, %v1451_v4  ;;  %1948 = vrcp.f32 %v1049_v3  ;;  %vm1465_vm7 = vmor %vm1463_vm6, %vm1464_vm5  ;;  %v1484_v26 = vand.u32 2147483648, %v1049_v3  ;;  %v1482_v29 = vand.u32 2147483647, %v1049_v3 }
 0x28c   : > { %1560 = vst.msk [vmem:[%s2184_s17 + $0xd0] sm:$0xff] %vm1533_vm3, %v1456_v6  ;;  %v1460_v7 = vsub.f32 1.0, %v1459_v5  ;;  %vm1478_vm10 = vweird.f32 %v1049_v3 }
 0x28d   : > { %v888_v9 = vpop.xlane.xlu0 %887  ;;  %v1485_v35 = vor.u32 1.1754944e-38, %v1484_v26  ;;  %vm1483_vm12 = vcmp.eq.f32.partialorder %v1482_v29, 8.507059e+37 }
 0x28e   : > { %v1461_v10 = vmul.f32 %v1945_v1, %v1460_v7  ;;  %v923_v12 = vadd.f32 %v2168_v22, %v888_v9 }
 0x290   : > { %v1947_v13 = vpop.eup %1946  ;;  %v1462_v14 = vadd.f32 %v1945_v1, %v1461_v10  ;;  %v1781_v15 = vmul.f32 -1.442695, %v923_v12 }
 0x291   : > { %v1949_v16 = vpop.eup %1948  ;;  %v1050_v18 = vadd.f32 1.0, %v1947_v13 }
 0x292   : > { %v1466_v19 = vsel %vm1465_vm7, %v1945_v1, %v1462_v14  ;;  %v1474_v20 = vmul.f32 %v1949_v16, %v1049_v3  ;;  %1950 = vpow2.f32 %v1781_v15  ;;  %vm1479_vm9 = vweird.f32 %v1949_v16 }
 0x293   : > { %v1471_v21 = vsel %vm1468_vm8, %v1470_v17, %v1466_v19  ;;  %1952 = vrcp.f32 %v1050_v18  ;;  %vm1480_vm11 = vmor %vm1478_vm10, %vm1479_vm9  ;;  %v1499_v39 = vand.u32 2147483648, %v1050_v18  ;;  %v1497_v42 = vand.u32 2147483647, %v1050_v18 }
 0x294   : > { %1561 = vst.msk [vmem:[%s2184_s17 + $0xd8] sm:$0xff] %vm1533_vm3, %v1471_v21  ;;  %v1475_v24 = vsub.f32 1.0, %v1474_v20  ;;  %vm1493_vm14 = vweird.f32 %v1050_v18 }
 0x295   : > { %v890_v23 = vpop.xlane.xlu1 %889  ;;  %v1500_v45 = vor.u32 1.1754944e-38, %v1499_v39  ;;  %vm1498_vm0 = vcmp.eq.f32.partialorder %v1497_v42, 8.507059e+37 }
 0x296   : > { %v924_v25 = vadd.f32 %v2168_v22, %v890_v23  ;;  %v1476_v28 = vmul.f32 %v1949_v16, %v1475_v24 }
 0x298   : > { %v1782_v30 = vmul.f32 -1.442695, %v924_v25  ;;  %v1951_v31 = vpop.eup %1950  ;;  %v1477_v32 = vadd.f32 %v1949_v16, %v1476_v28 }
 0x299   : > { %v1953_v34 = vpop.eup %1952  ;;  %v1051_v36 = vadd.f32 1.0, %v1951_v31 }
 0x29a   : > { %1954 = vpow2.f32 %v1782_v30  ;;  %v1481_v37 = vsel %vm1480_vm11, %v1949_v16, %v1477_v32  ;;  %v1489_v38 = vmul.f32 %v1953_v34, %v1050_v18  ;;  %vm1494_vm13 = vweird.f32 %v1953_v34 }
 0x29b   : > { %v1486_v27 = vsel %vm1483_vm12, %v1485_v35, %v1481_v37  ;;  %1956 = vrcp.f32 %v1051_v36  ;;  %vm1495_vm15 = vmor %vm1493_vm14, %vm1494_vm13  ;;  %v1514_v50 = vand.u32 2147483648, %v1051_v36  ;;  %v1512_v52 = vand.u32 2147483647, %v1051_v36 }
 0x29c   : > { %1562 = vst.msk [vmem:[%s2184_s17 + $0xe0] sm:$0xff] %vm1533_vm3, %v1486_v27  ;;  %v1490_v22 = vsub.f32 1.0, %v1489_v38  ;;  %vm1508_vm2 = vweird.f32 %v1051_v36 }
 0x29d   : > { %v1515_v56 = vor.u32 1.1754944e-38, %v1514_v50  ;;  %vm1513_vm5 = vcmp.eq.f32.partialorder %v1512_v52, 8.507059e+37 }
 0x29e   : > { %v1491_v41 = vmul.f32 %v1953_v34, %v1490_v22 }
 0x2a0   : > { %v1955_v40 = vpop.eup %1954  ;;  %v1492_v33 = vadd.f32 %v1953_v34, %v1491_v41 }
 0x2a1   : > { %v1052_v43 = vadd.f32 1.0, %v1955_v40  ;;  %v1957_v44 = vpop.eup %1956 }
 0x2a2   : > { %v1496_v46 = vsel %vm1495_vm15, %v1953_v34, %v1492_v33  ;;  %v1504_v47 = vmul.f32 %v1957_v44, %v1051_v36  ;;  %vm1509_vm1 = vweird.f32 %v1957_v44 }
 0x2a3   : > { %1958 = vrcp.f32 %v1052_v43  ;;  %v1501_v48 = vsel %vm1498_vm0, %v1500_v45, %v1496_v46  ;;  %vm1510_vm4 = vmor %vm1508_vm2, %vm1509_vm1  ;;  %v1529_v60 = vand.u32 2147483648, %v1052_v43  ;;  %v1527_v62 = vand.u32 2147483647, %v1052_v43 }
 0x2a4   : > { %1563 = vst.msk [vmem:[%s2184_s17 + $0xe8] sm:$0xff] %vm1533_vm3, %v1501_v48  ;;  %v1505_v49 = vsub.f32 1.0, %v1504_v47  ;;  %vm1523_vm7 = vweird.f32 %v1052_v43 }
 0x2a5   : > { %v1530_v0 = vor.u32 1.1754944e-38, %v1529_v60  ;;  %vm1528_vm9 = vcmp.eq.f32.partialorder %v1527_v62, 8.507059e+37 }
 0x2a6   : > { %v1506_v51 = vmul.f32 %v1957_v44, %v1505_v49 }
 0x2a8   : > { %v1507_v54 = vadd.f32 %v1957_v44, %v1506_v51 }
 0x2a9   : > { %v1959_v53 = vpop.eup %1958 }
 0x2aa   : > { %v1519_v55 = vmul.f32 %v1959_v53, %v1052_v43  ;;  %v1511_v57 = vsel %vm1510_vm4, %v1957_v44, %v1507_v54  ;;  %vm1524_vm6 = vweird.f32 %v1959_v53 }
 0x2ab   : > { %v1516_v59 = vsel %vm1513_vm5, %v1515_v56, %v1511_v57  ;;  %vm1525_vm8 = vmor %vm1523_vm7, %vm1524_vm6 }
 0x2ac   : > { %v1520_v58 = vsub.f32 1.0, %v1519_v55  ;;  %1564 = vst.msk [vmem:[%s2184_s17 + $0xf0] sm:$0xff] %vm1533_vm3, %v1516_v59 }
 0x2ae   : > { %v1521_v61 = vmul.f32 %v1959_v53, %v1520_v58 }
 0x2b0   : > { %v1522_v63 = vadd.f32 %v1959_v53, %v1521_v61 }
 0x2b2   : > { %v1526_v1 = vsel %vm1525_vm8, %v1959_v53, %v1522_v63 }
 0x2b3   : > { %v1531_v2 = vsel %vm1528_vm9, %v1530_v0, %v1526_v1 }
 0x2b4   : > { %1565 = vst.msk [vmem:[%s2184_s17 + $0xf8] sm:$0xff] %vm1533_vm3, %v1531_v2 }
 0x2b5 PF: > { %s18_s26 = sadd.s32 1, %s1968_s26  }
 0x2b6   : > { %p15_p4 = scmp.ge.s32.totalorder %s18_s26, 4  }
 0x2b8   :  { %17 = sbr.rel (!%p15_p4) target bundleno = 2 (0x2), region = 78 }

</bundles_post_ra>
